<compile_context>
chip_gen: v6e
topology: v6e:2x2x1
jax: 0.10.0
libtpu: 0.0.40
codegen_flags: <defaults>
</compile_context>

<pallas_src>
import functools

import jax
import jax.numpy as jnp
from jax import lax
from jax.experimental import pallas as pl
from jax.experimental.pallas import tpu as pltpu


# --------------------------------------------------------------------------
# Fused Pallas kernel: multi-layer LSTM + Linear head, one batch tile per
# grid step.  All refs live in VMEM.
# --------------------------------------------------------------------------
def _fused_lstm_kernel(*refs, n_layers, fwindow):
    if n_layers > 1:
        (x_ref, wih0_ref, b0_ref, whh_ref, wih_ref, b_ref,
         wlin_ref, blin_ref, out_ref, act_scr, xg_scr) = refs
    else:
        (x_ref, wih0_ref, b0_ref, whh_ref,
         wlin_ref, blin_ref, out_ref, act_scr, xg_scr) = refs
        wih_ref = b_ref = None

    # x_ref   : (T, BT, Dp)   f32   input slab for this batch tile
    # wih0_ref: (Dp, 4H)      wd    packed layer-0 input-proj weight
    # b0_ref  : (1, 4H)       f32   combined layer-0 bias
    # whh_ref : (L, H, 4H)    wd    packed recurrent weights (= W_hh.T)
    # wih_ref : (L-1, H, 4H)  wd    packed input-proj weights, layers >= 1
    # b_ref   : (L-1, 1, 4H)  f32   combined biases, layers >= 1
    # wlin_ref: (H, OP)       wd    lane-padded Linear head weight
    # blin_ref: (1, OP)       f32   lane-padded Linear head bias
    # out_ref : (F, BT, OP)   f32
    # act_scr : (T, BT, H)    f32   inter-layer hidden states
    # xg_scr  : (T, BT, 4H)   f32   hoisted gate pre-activations (reused/layer)
    T, BT, H = act_scr.shape
    G4 = 4 * H
    f32 = jnp.float32
    wd = whh_ref.dtype
    unroll = True if T <= 16 else 8

    def run_layer(layer):
        # Loop-invariant packed recurrent weight: a single (H, 4H) tile,
        # hoisted so it stays resident in vregs across the unrolled steps.
        w_l = whh_ref[layer]

        def step(t, carry):
            h, c = carry
            # One full-lane MXU dot per step; gates come out packed [i|f|g|o].
            pre = xg_scr[t] + jnp.dot(h.astype(wd), w_l,
                                      preferred_element_type=f32)
            sg = jax.nn.sigmoid(pre)          # one packed EUP pass
            th = jnp.tanh(pre)                # one packed EUP pass
            i_g = sg[:, 0 * H:1 * H]
            f_g = sg[:, 1 * H:2 * H]
            g_g = th[:, 2 * H:3 * H]
            o_g = sg[:, 3 * H:4 * H]
            c_new = f_g * c + i_g * g_g
            h_new = o_g * jnp.tanh(c_new)
            act_scr[t] = h_new
            return (h_new, c_new)

        zeros = jnp.zeros((BT, H), f32)
        lax.fori_loop(0, T, step, (zeros, zeros), unroll=unroll)

    # ---- layer 0: time-parallel input projection done in-kernel (one dot).
    Dp = x_ref.shape[-1]
    x2d = x_ref[...].reshape(T * BT, Dp).astype(wd)
    xg0 = jnp.dot(x2d, wih0_ref[...], preferred_element_type=f32) + b0_ref[...]
    xg_scr[...] = xg0.reshape(T, BT, G4)
    run_layer(0)

    # ---- layers 1..L-1: hoist the input projection out of the recurrence as
    # one packed (T*BT, H) x (H, 4H) MXU matmul; reuse the same gate scratch.
    for layer in range(1, n_layers):
        a2d = act_scr[...].reshape(T * BT, H).astype(wd)
        xg = (jnp.dot(a2d, wih_ref[layer - 1], preferred_element_type=f32)
              + b_ref[layer - 1])
        xg_scr[...] = xg.reshape(T, BT, G4)
        run_layer(layer)

    # ---- fused Linear head over only the last `fwindow` timesteps.
    F = fwindow
    tail = act_scr[pl.ds(T - F, F)]                          # (F, BT, H)
    out2d = (jnp.dot(tail.reshape(F * BT, H).astype(wd), wlin_ref[...],
                     preferred_element_type=f32)
             + blin_ref[...])
    out_ref[...] = out2d.reshape(F, BT, blin_ref.shape[-1])


# --------------------------------------------------------------------------
# Parameter re-layout (outside the per-call hot path; call once per params)
# --------------------------------------------------------------------------
def pack_params(lstm_params, lin_params, weight_dtype=jnp.bfloat16):
    """PyTorch layouts -> lane-packed kernel layouts.

    lstm_params: list of (w_ih (4H,Din), w_hh (4H,H), b_ih (4H,), b_hh (4H,))
    lin_params : (w_lin (O,H), b_lin (O,))
    """
    w_lin, b_lin = lin_params
    n_layers = len(lstm_params)
    H = lstm_params[0][1].shape[1]
    D = lstm_params[0][0].shape[1]
    O = w_lin.shape[0]
    Dp = max(8, ((D + 7) // 8) * 8)           # pad K of layer-0 proj to 8
    OP = ((O + 127) // 128) * 128             # lane-dense head output width
    wd = weight_dtype
    G4 = 4 * H

    w_ih0, _, b_ih0, b_hh0 = lstm_params[0]
    wih0 = jnp.zeros((Dp, G4), wd).at[:D].set(w_ih0.T.astype(wd))
    b0 = (b_ih0 + b_hh0).reshape(1, G4).astype(jnp.float32)

    # Packed recurrent weights: h @ W_hh.T  ==  h @ whh_packed, gates [i|f|g|o].
    whh = jnp.stack([p[1].T.astype(wd) for p in lstm_params])       # (L,H,4H)

    packed = {"wih0": wih0, "b0": b0, "whh": whh}
    if n_layers > 1:
        packed["wih_rest"] = jnp.stack(
            [p[0].T.astype(wd) for p in lstm_params[1:]])           # (L-1,H,4H)
        packed["b_rest"] = jnp.stack(
            [(p[2] + p[3]).reshape(1, G4).astype(jnp.float32)
             for p in lstm_params[1:]])                              # (L-1,1,4H)

    packed["wlin"] = jnp.zeros((H, OP), wd).at[:, :O].set(w_lin.T.astype(wd))
    packed["blin"] = (jnp.zeros((1, OP), jnp.float32)
                      .at[:, :O].set(b_lin[None, :].astype(jnp.float32)))
    return packed


# --------------------------------------------------------------------------
# Wrapper
# --------------------------------------------------------------------------
@functools.partial(jax.jit, static_argnames=("fwindow", "out_dim", "batch_tile"))
def lstm_linear_forward(x, packed, *, fwindow, out_dim, batch_tile=8):
    """x: (B, T, input_dim) -> (B, fwindow, out_dim)."""
    whh = packed["whh"]
    n_layers, H, G4 = whh.shape
    wih0, b0 = packed["wih0"], packed["b0"]
    wlin, blin = packed["wlin"], packed["blin"]
    Dp = wih0.shape[0]
    OP = wlin.shape[1]

    B, T, D = x.shape
    BT = batch_tile
    Bp = ((max(B, BT) + BT - 1) // BT) * BT
    nb = Bp // BT

    # (B, T, D) -> (T, Bp, Dp)   [matches x.transpose(0, 1) in the module]
    x_tbd = jnp.transpose(x, (1, 0, 2)).astype(jnp.float32)
    x_tbd = jnp.pad(x_tbd, ((0, 0), (0, Bp - B), (0, Dp - D)))

    inputs = [x_tbd, wih0, b0, whh]
    in_specs = [
        pl.BlockSpec((T, BT, Dp), lambda b: (0, b, 0)),
        pl.BlockSpec((Dp, G4), lambda b: (0, 0)),
        pl.BlockSpec((1, G4), lambda b: (0, 0)),
        pl.BlockSpec((n_layers, H, G4), lambda b: (0, 0, 0)),
    ]
    if n_layers > 1:
        inputs += [packed["wih_rest"], packed["b_rest"]]
        in_specs += [
            pl.BlockSpec((n_layers - 1, H, G4), lambda b: (0, 0, 0)),
            pl.BlockSpec((n_layers - 1, 1, G4), lambda b: (0, 0, 0)),
        ]
    inputs += [wlin, blin]
    in_specs += [
        pl.BlockSpec((H, OP), lambda b: (0, 0)),
        pl.BlockSpec((1, OP), lambda b: (0, 0)),
    ]

    # VMEM budget (double-buffered inputs/outputs + scratch), capped for v7x.
    block_bytes = sum(int(a.size) * a.dtype.itemsize for a in inputs)
    block_bytes += fwindow * BT * OP * 4
    scratch_bytes = (T * BT * H + T * BT * G4) * 4
    est = 2 * block_bytes + scratch_bytes
    vmem_limit = int(min(64 * 2**20, max(32 * 2**20, 2 * est)))

    kernel = functools.partial(_fused_lstm_kernel,
                               n_layers=int(n_layers), fwindow=fwindow)
    out = pl.pallas_call(
        kernel,
        out_shape=jax.ShapeDtypeStruct((fwindow, Bp, OP), jnp.float32),
        grid=(nb,),
        in_specs=in_specs,
        out_specs=pl.BlockSpec((fwindow, BT, OP), lambda b: (0, b, 0)),
        scratch_shapes=[
            pltpu.VMEM((T, BT, H), jnp.float32),     # inter-layer activations
            pltpu.VMEM((T, BT, G4), jnp.float32),    # packed gate pre-acts
        ],
        compiler_params=pltpu.CompilerParams(
            dimension_semantics=("parallel",),       # 2-TC sharding on v7x
            vmem_limit_bytes=vmem_limit),
    )(*inputs)

    out = out[:, :B, :out_dim]                 # strip batch / lane padding
    return jnp.transpose(out, (1, 0, 2))       # (B, fwindow, O)


# --------------------------------------------------------------------------
# Pure-JAX reference (correctness check only)
# --------------------------------------------------------------------------
def reference_forward(x, lstm_params, lin_params, fwindow):
    w_lin, b_lin = lin_params
    h_seq = jnp.transpose(x, (1, 0, 2))        # (T, B, D)
    for (w_ih, w_hh, b_ih, b_hh) in lstm_params:
        H = w_hh.shape[1]
        B = h_seq.shape[1]
        b = b_ih + b_hh

        def step(carry, x_t, w_ih=w_ih, w_hh=w_hh, b=b, H=H):
            h, c = carry
            gates = x_t @ w_ih.T + h @ w_hh.T + b
            i = jax.nn.sigmoid(gates[:, 0 * H:1 * H])
            f = jax.nn.sigmoid(gates[:, 1 * H:2 * H])
            g = jnp.tanh(gates[:, 2 * H:3 * H])
            o = jax.nn.sigmoid(gates[:, 3 * H:4 * H])
            c = f * c + i * g
            h = o * jnp.tanh(c)
            return (h, c), h

        init = (jnp.zeros((B, H), jnp.float32), jnp.zeros((B, H), jnp.float32))
        _, h_seq = lax.scan(step, init, h_seq)
    pred = h_seq[-fwindow:] @ w_lin.T + b_lin
    return jnp.transpose(pred, (1, 0, 2))


# --------------------------------------------------------------------------
# Parameter init (deterministic, mimics torch uniform(-1/sqrt(H), 1/sqrt(H)))
# --------------------------------------------------------------------------
def init_params(key, input_dim, output_dim, hidden_size, n_layers):
    bound = hidden_size ** -0.5
    lstm_params = []
    for layer in range(n_layers):
        d_in = input_dim if layer == 0 else hidden_size
        key, k1, k2, k3, k4 = jax.random.split(key, 5)
        w_ih = jax.random.uniform(k1, (4 * hidden_size, d_in), jnp.float32,
                                  -bound, bound)
        w_hh = jax.random.uniform(k2, (4 * hidden_size, hidden_size),
                                  jnp.float32, -bound, bound)
        b_ih = jax.random.uniform(k3, (4 * hidden_size,), jnp.float32,
                                  -bound, bound)
        b_hh = jax.random.uniform(k4, (4 * hidden_size,), jnp.float32,
                                  -bound, bound)
        lstm_params.append((w_ih, w_hh, b_ih, b_hh))
    key, k5, k6 = jax.random.split(key, 3)
    w_lin = jax.random.uniform(k5, (output_dim, hidden_size), jnp.float32,
                               -bound, bound)
    b_lin = jax.random.uniform(k6, (output_dim,), jnp.float32, -bound, bound)
    return lstm_params, (w_lin, b_lin)


# --------------------------------------------------------------------------
if __name__ == "__main__":
    batch, seq_len = 2, 8
    input_dim, output_dim = 4, 3
    hidden_size, n_layers = 32, 2
    fwindow = 4            # seqlen_target

    key = jax.random.PRNGKey(0)
    key, kx, kp = jax.random.split(key, 3)
    x = jax.random.normal(kx, (batch, seq_len, input_dim), jnp.float32)
    lstm_params, lin_params = init_params(
        kp, input_dim, output_dim, hidden_size, n_layers)

    ref = reference_forward(x, lstm_params, lin_params, fwindow)

    # --- f32 weights: tight check against the pure-JAX reference.
    packed_f32 = pack_params(lstm_params, lin_params, weight_dtype=jnp.float32)
    out_f32 = lstm_linear_forward(x, packed_f32, fwindow=fwindow,
                                  out_dim=output_dim)
    out_f32 = jax.block_until_ready(out_f32)
    assert out_f32.shape == (batch, fwindow, output_dim), out_f32.shape
    assert jnp.allclose(out_f32, ref, atol=1e-4, rtol=1e-4), (
        "f32 mismatch vs reference, max abs diff = "
        + str(float(jnp.max(jnp.abs(out_f32 - ref)))))

    # --- bf16 weights (default fast path): loose check, expected small drift.
    packed_bf16 = pack_params(lstm_params, lin_params,
                              weight_dtype=jnp.bfloat16)
    out_bf16 = lstm_linear_forward(x, packed_bf16, fwindow=fwindow,
                                   out_dim=output_dim)
    out_bf16 = jax.block_until_ready(out_bf16)
    assert out_bf16.shape == (batch, fwindow, output_dim), out_bf16.shape
    assert bool(jnp.all(jnp.isfinite(out_bf16)))
    assert jnp.allclose(out_bf16, ref, atol=2e-2, rtol=2e-2), (
        "bf16 mismatch vs reference, max abs diff = "
        + str(float(jnp.max(jnp.abs(out_bf16 - ref)))))

    print("KERNEL_OK")
</pallas_src>

<mosaic_0001>
module attributes {stable_mosaic.version = 11 : i64} {
  func.func @_fused_lstm_kernel(%arg0: i32, %arg1: memref<8x8x8xf32, #tpu.memory_space<vmem>>, %arg2: memref<8x128xf32, #tpu.memory_space<vmem>>, %arg3: memref<1x128xf32, #tpu.memory_space<vmem>>, %arg4: memref<2x32x128xf32, #tpu.memory_space<vmem>>, %arg5: memref<1x32x128xf32, #tpu.memory_space<vmem>>, %arg6: memref<1x1x128xf32, #tpu.memory_space<vmem>>, %arg7: memref<32x128xf32, #tpu.memory_space<vmem>>, %arg8: memref<1x128xf32, #tpu.memory_space<vmem>>, %arg9: memref<4x8x128xf32, #tpu.memory_space<vmem>>, %arg10: memref<8x8x32xf32, #tpu.memory_space<vmem>>, %arg11: memref<8x8x128xf32, #tpu.memory_space<vmem>>) attributes {dimension_semantics = [#tpu.dimension_semantics<parallel>], iteration_bounds = array<i64: 1>, scalar_prefetch = 0 : i64, scratch_operands = 2 : i64, tpu.core_type = #tpu.core_type<tc>, window_params = [{transform_indices = @transform_0, window_bounds = array<i64: 8, 8, 8>}, {pipeline_mode = #tpu.pipeline_mode<synchronous>, transform_indices = @transform_1, window_bounds = array<i64: 8, 128>}, {pipeline_mode = #tpu.pipeline_mode<synchronous>, transform_indices = @transform_2, window_bounds = array<i64: 1, 128>}, {pipeline_mode = #tpu.pipeline_mode<synchronous>, transform_indices = @transform_3, window_bounds = array<i64: 2, 32, 128>}, {pipeline_mode = #tpu.pipeline_mode<synchronous>, transform_indices = @transform_4, window_bounds = array<i64: 1, 32, 128>}, {pipeline_mode = #tpu.pipeline_mode<synchronous>, transform_indices = @transform_5, window_bounds = array<i64: 1, 1, 128>}, {pipeline_mode = #tpu.pipeline_mode<synchronous>, transform_indices = @transform_6, window_bounds = array<i64: 32, 128>}, {pipeline_mode = #tpu.pipeline_mode<synchronous>, transform_indices = @transform_7, window_bounds = array<i64: 1, 128>}, {transform_indices = @transform_8, window_bounds = array<i64: 4, 8, 128>}]} {
    %c0 = arith.constant 0 : index
    %c0_0 = arith.constant 0 : index
    %c0_1 = arith.constant 0 : index
    %0 = vector.load %arg1[%c0, %c0_0, %c0_1] : memref<8x8x8xf32, #tpu.memory_space<vmem>>, vector<8x8x8xf32>
    %1 = vector.shape_cast %0 : vector<8x8x8xf32> to vector<64x8xf32>
    %c0_2 = arith.constant 0 : index
    %c0_3 = arith.constant 0 : index
    %2 = vector.load %arg2[%c0_2, %c0_3] : memref<8x128xf32, #tpu.memory_space<vmem>>, vector<8x128xf32>
    %cst = arith.constant dense<0.000000e+00> : vector<64x128xf32>
    %3 = tpu.matmul %1, %2, %cst {dimension_numbers = #tpu.dot_dimension_numbers<[1], [0], [0], [1], [0, 0, 1, 1], [], []>} : vector<64x8xf32>, vector<8x128xf32>, vector<64x128xf32> -> vector<64x128xf32>
    %c0_4 = arith.constant 0 : index
    %c0_5 = arith.constant 0 : index
    %4 = vector.load %arg3[%c0_4, %c0_5] : memref<1x128xf32, #tpu.memory_space<vmem>>, vector<1x128xf32>
    %5 = vector.broadcast %4 : vector<1x128xf32> to vector<64x128xf32>
    %6 = arith.addf %3, %5 : vector<64x128xf32>
    %7 = vector.shape_cast %6 : vector<64x128xf32> to vector<8x8x128xf32>
    %c0_6 = arith.constant 0 : index
    %c0_7 = arith.constant 0 : index
    %c0_8 = arith.constant 0 : index
    %8 = vector.load %arg11[%c0_6, %c0_7, %c0_8] : memref<8x8x128xf32, #tpu.memory_space<vmem>>, vector<8x8x128xf32>
    tpu.vector_store %arg11[%c0_6, %c0_7, %c0_8], %7 {strides = array<i32>} : memref<8x8x128xf32, #tpu.memory_space<vmem>>, vector<8x8x128xf32>,
    %c0_9 = arith.constant 0 : index
    %c0_10 = arith.constant 0 : index
    %c0_11 = arith.constant 0 : index
    %9 = vector.load %arg4[%c0_9, %c0_10, %c0_11] : memref<2x32x128xf32, #tpu.memory_space<vmem>>, vector<1x32x128xf32>
    %10 = vector.shape_cast %9 : vector<1x32x128xf32> to vector<32x128xf32>
    %cst_12 = arith.constant 0.000000e+00 : f32
    %11 = vector.broadcast %cst_12 : f32 to vector<8x32xf32>
    %c0_i32 = arith.constant 0 : i32
    %12 = arith.index_cast %c0_i32 : i32 to index
    %c0_13 = arith.constant 0 : index
    %c0_14 = arith.constant 0 : index
    %13 = vector.load %arg11[%12, %c0_13, %c0_14] : memref<8x8x128xf32, #tpu.memory_space<vmem>>, vector<1x8x128xf32>
    %14 = vector.shape_cast %13 : vector<1x8x128xf32> to vector<8x128xf32>
    %cst_15 = arith.constant dense<0.000000e+00> : vector<8x128xf32>
    %15 = tpu.matmul %11, %10, %cst_15 {dimension_numbers = #tpu.dot_dimension_numbers<[1], [0], [0], [1], [0, 0, 1, 1], [], []>} : vector<8x32xf32>, vector<32x128xf32>, vector<8x128xf32> -> vector<8x128xf32>
    %16 = arith.addf %14, %15 : vector<8x128xf32>
    %17 = arith.negf %16 : vector<8x128xf32>
    %18 = math.exp %17 : vector<8x128xf32>
    %cst_16 = arith.constant 1.000000e+00 : f32
    %19 = vector.broadcast %cst_16 : f32 to vector<8x128xf32>
    %20 = arith.addf %19, %18 : vector<8x128xf32>
    %21 = arith.divf %19, %20 : vector<8x128xf32>
    %22 = math.tanh %16 : vector<8x128xf32>
    %23 = vector.extract_strided_slice %21 {offsets = [0, 0], sizes = [8, 32], strides = [1, 1]} : vector<8x128xf32> to vector<8x32xf32>
    %24 = vector.extract_strided_slice %21 {offsets = [0, 32], sizes = [8, 32], strides = [1, 1]} : vector<8x128xf32> to vector<8x32xf32>
    %25 = vector.extract_strided_slice %22 {offsets = [0, 64], sizes = [8, 32], strides = [1, 1]} : vector<8x128xf32> to vector<8x32xf32>
    %26 = vector.extract_strided_slice %21 {offsets = [0, 96], sizes = [8, 32], strides = [1, 1]} : vector<8x128xf32> to vector<8x32xf32>
    %27 = arith.mulf %24, %11 : vector<8x32xf32>
    %28 = arith.mulf %23, %25 : vector<8x32xf32>
    %29 = arith.addf %27, %28 : vector<8x32xf32>
    %30 = math.tanh %29 : vector<8x32xf32>
    %31 = arith.mulf %26, %30 : vector<8x32xf32>
    %32 = arith.index_cast %c0_i32 : i32 to index
    %c0_17 = arith.constant 0 : index
    %c0_18 = arith.constant 0 : index
    %33 = vector.load %arg10[%32, %c0_17, %c0_18] : memref<8x8x32xf32, #tpu.memory_space<vmem>>, vector<1x8x32xf32>
    %34 = vector.shape_cast %33 : vector<1x8x32xf32> to vector<8x32xf32>
    %35 = vector.shape_cast %31 : vector<8x32xf32> to vector<1x8x32xf32>
    tpu.vector_store %arg10[%32, %c0_17, %c0_18], %35 {strides = array<i32>} : memref<8x8x32xf32, #tpu.memory_space<vmem>>, vector<1x8x32xf32>,
    %c1_i32 = arith.constant 1 : i32
    %36 = arith.index_cast %c1_i32 : i32 to index
    %c0_19 = arith.constant 0 : index
    %c0_20 = arith.constant 0 : index
    %37 = vector.load %arg11[%36, %c0_19, %c0_20] : memref<8x8x128xf32, #tpu.memory_space<vmem>>, vector<1x8x128xf32>
    %38 = vector.shape_cast %37 : vector<1x8x128xf32> to vector<8x128xf32>
    %cst_21 = arith.constant dense<0.000000e+00> : vector<8x128xf32>
    %39 = tpu.matmul %31, %10, %cst_21 {dimension_numbers = #tpu.dot_dimension_numbers<[1], [0], [0], [1], [0, 0, 1, 1], [], []>} : vector<8x32xf32>, vector<32x128xf32>, vector<8x128xf32> -> vector<8x128xf32>
    %40 = arith.addf %38, %39 : vector<8x128xf32>
    %41 = arith.negf %40 : vector<8x128xf32>
    %42 = math.exp %41 : vector<8x128xf32>
    %cst_22 = arith.constant 1.000000e+00 : f32
    %43 = vector.broadcast %cst_22 : f32 to vector<8x128xf32>
    %44 = arith.addf %43, %42 : vector<8x128xf32>
    %45 = arith.divf %43, %44 : vector<8x128xf32>
    %46 = math.tanh %40 : vector<8x128xf32>
    %47 = vector.extract_strided_slice %45 {offsets = [0, 0], sizes = [8, 32], strides = [1, 1]} : vector<8x128xf32> to vector<8x32xf32>
    %48 = vector.extract_strided_slice %45 {offsets = [0, 32], sizes = [8, 32], strides = [1, 1]} : vector<8x128xf32> to vector<8x32xf32>
    %49 = vector.extract_strided_slice %46 {offsets = [0, 64], sizes = [8, 32], strides = [1, 1]} : vector<8x128xf32> to vector<8x32xf32>
    %50 = vector.extract_strided_slice %45 {offsets = [0, 96], sizes = [8, 32], strides = [1, 1]} : vector<8x128xf32> to vector<8x32xf32>
    %51 = arith.mulf %48, %29 : vector<8x32xf32>
    %52 = arith.mulf %47, %49 : vector<8x32xf32>
    %53 = arith.addf %51, %52 : vector<8x32xf32>
    %54 = math.tanh %53 : vector<8x32xf32>
    %55 = arith.mulf %50, %54 : vector<8x32xf32>
    %56 = arith.index_cast %c1_i32 : i32 to index
    %c0_23 = arith.constant 0 : index
    %c0_24 = arith.constant 0 : index
    %57 = vector.load %arg10[%56, %c0_23, %c0_24] : memref<8x8x32xf32, #tpu.memory_space<vmem>>, vector<1x8x32xf32>
    %58 = vector.shape_cast %57 : vector<1x8x32xf32> to vector<8x32xf32>
    %59 = vector.shape_cast %55 : vector<8x32xf32> to vector<1x8x32xf32>
    tpu.vector_store %arg10[%56, %c0_23, %c0_24], %59 {strides = array<i32>} : memref<8x8x32xf32, #tpu.memory_space<vmem>>, vector<1x8x32xf32>,
    %c2_i32 = arith.constant 2 : i32
    %60 = arith.index_cast %c2_i32 : i32 to index
    %c0_25 = arith.constant 0 : index
    %c0_26 = arith.constant 0 : index
    %61 = vector.load %arg11[%60, %c0_25, %c0_26] : memref<8x8x128xf32, #tpu.memory_space<vmem>>, vector<1x8x128xf32>
    %62 = vector.shape_cast %61 : vector<1x8x128xf32> to vector<8x128xf32>
    %cst_27 = arith.constant dense<0.000000e+00> : vector<8x128xf32>
    %63 = tpu.matmul %55, %10, %cst_27 {dimension_numbers = #tpu.dot_dimension_numbers<[1], [0], [0], [1], [0, 0, 1, 1], [], []>} : vector<8x32xf32>, vector<32x128xf32>, vector<8x128xf32> -> vector<8x128xf32>
    %64 = arith.addf %62, %63 : vector<8x128xf32>
    %65 = arith.negf %64 : vector<8x128xf32>
    %66 = math.exp %65 : vector<8x128xf32>
    %cst_28 = arith.constant 1.000000e+00 : f32
    %67 = vector.broadcast %cst_28 : f32 to vector<8x128xf32>
    %68 = arith.addf %67, %66 : vector<8x128xf32>
    %69 = arith.divf %67, %68 : vector<8x128xf32>
    %70 = math.tanh %64 : vector<8x128xf32>
    %71 = vector.extract_strided_slice %69 {offsets = [0, 0], sizes = [8, 32], strides = [1, 1]} : vector<8x128xf32> to vector<8x32xf32>
    %72 = vector.extract_strided_slice %69 {offsets = [0, 32], sizes = [8, 32], strides = [1, 1]} : vector<8x128xf32> to vector<8x32xf32>
    %73 = vector.extract_strided_slice %70 {offsets = [0, 64], sizes = [8, 32], strides = [1, 1]} : vector<8x128xf32> to vector<8x32xf32>
    %74 = vector.extract_strided_slice %69 {offsets = [0, 96], sizes = [8, 32], strides = [1, 1]} : vector<8x128xf32> to vector<8x32xf32>
    %75 = arith.mulf %72, %53 : vector<8x32xf32>
    %76 = arith.mulf %71, %73 : vector<8x32xf32>
    %77 = arith.addf %75, %76 : vector<8x32xf32>
    %78 = math.tanh %77 : vector<8x32xf32>
    %79 = arith.mulf %74, %78 : vector<8x32xf32>
    %80 = arith.index_cast %c2_i32 : i32 to index
    %c0_29 = arith.constant 0 : index
    %c0_30 = arith.constant 0 : index
    %81 = vector.load %arg10[%80, %c0_29, %c0_30] : memref<8x8x32xf32, #tpu.memory_space<vmem>>, vector<1x8x32xf32>
    %82 = vector.shape_cast %81 : vector<1x8x32xf32> to vector<8x32xf32>
    %83 = vector.shape_cast %79 : vector<8x32xf32> to vector<1x8x32xf32>
    tpu.vector_store %arg10[%80, %c0_29, %c0_30], %83 {strides = array<i32>} : memref<8x8x32xf32, #tpu.memory_space<vmem>>, vector<1x8x32xf32>,
    %c3_i32 = arith.constant 3 : i32
    %84 = arith.index_cast %c3_i32 : i32 to index
    %c0_31 = arith.constant 0 : index
    %c0_32 = arith.constant 0 : index
    %85 = vector.load %arg11[%84, %c0_31, %c0_32] : memref<8x8x128xf32, #tpu.memory_space<vmem>>, vector<1x8x128xf32>
    %86 = vector.shape_cast %85 : vector<1x8x128xf32> to vector<8x128xf32>
    %cst_33 = arith.constant dense<0.000000e+00> : vector<8x128xf32>
    %87 = tpu.matmul %79, %10, %cst_33 {dimension_numbers = #tpu.dot_dimension_numbers<[1], [0], [0], [1], [0, 0, 1, 1], [], []>} : vector<8x32xf32>, vector<32x128xf32>, vector<8x128xf32> -> vector<8x128xf32>
    %88 = arith.addf %86, %87 : vector<8x128xf32>
    %89 = arith.negf %88 : vector<8x128xf32>
    %90 = math.exp %89 : vector<8x128xf32>
    %cst_34 = arith.constant 1.000000e+00 : f32
    %91 = vector.broadcast %cst_34 : f32 to vector<8x128xf32>
    %92 = arith.addf %91, %90 : vector<8x128xf32>
    %93 = arith.divf %91, %92 : vector<8x128xf32>
    %94 = math.tanh %88 : vector<8x128xf32>
    %95 = vector.extract_strided_slice %93 {offsets = [0, 0], sizes = [8, 32], strides = [1, 1]} : vector<8x128xf32> to vector<8x32xf32>
    %96 = vector.extract_strided_slice %93 {offsets = [0, 32], sizes = [8, 32], strides = [1, 1]} : vector<8x128xf32> to vector<8x32xf32>
    %97 = vector.extract_strided_slice %94 {offsets = [0, 64], sizes = [8, 32], strides = [1, 1]} : vector<8x128xf32> to vector<8x32xf32>
    %98 = vector.extract_strided_slice %93 {offsets = [0, 96], sizes = [8, 32], strides = [1, 1]} : vector<8x128xf32> to vector<8x32xf32>
    %99 = arith.mulf %96, %77 : vector<8x32xf32>
    %100 = arith.mulf %95, %97 : vector<8x32xf32>
    %101 = arith.addf %99, %100 : vector<8x32xf32>
    %102 = math.tanh %101 : vector<8x32xf32>
    %103 = arith.mulf %98, %102 : vector<8x32xf32>
    %104 = arith.index_cast %c3_i32 : i32 to index
    %c0_35 = arith.constant 0 : index
    %c0_36 = arith.constant 0 : index
    %105 = vector.load %arg10[%104, %c0_35, %c0_36] : memref<8x8x32xf32, #tpu.memory_space<vmem>>, vector<1x8x32xf32>
    %106 = vector.shape_cast %105 : vector<1x8x32xf32> to vector<8x32xf32>
    %107 = vector.shape_cast %103 : vector<8x32xf32> to vector<1x8x32xf32>
    tpu.vector_store %arg10[%104, %c0_35, %c0_36], %107 {strides = array<i32>} : memref<8x8x32xf32, #tpu.memory_space<vmem>>, vector<1x8x32xf32>,
    %c4_i32 = arith.constant 4 : i32
    %108 = arith.index_cast %c4_i32 : i32 to index
    %c0_37 = arith.constant 0 : index
    %c0_38 = arith.constant 0 : index
    %109 = vector.load %arg11[%108, %c0_37, %c0_38] : memref<8x8x128xf32, #tpu.memory_space<vmem>>, vector<1x8x128xf32>
    %110 = vector.shape_cast %109 : vector<1x8x128xf32> to vector<8x128xf32>
    %cst_39 = arith.constant dense<0.000000e+00> : vector<8x128xf32>
    %111 = tpu.matmul %103, %10, %cst_39 {dimension_numbers = #tpu.dot_dimension_numbers<[1], [0], [0], [1], [0, 0, 1, 1], [], []>} : vector<8x32xf32>, vector<32x128xf32>, vector<8x128xf32> -> vector<8x128xf32>
    %112 = arith.addf %110, %111 : vector<8x128xf32>
    %113 = arith.negf %112 : vector<8x128xf32>
    %114 = math.exp %113 : vector<8x128xf32>
    %cst_40 = arith.constant 1.000000e+00 : f32
    %115 = vector.broadcast %cst_40 : f32 to vector<8x128xf32>
    %116 = arith.addf %115, %114 : vector<8x128xf32>
    %117 = arith.divf %115, %116 : vector<8x128xf32>
    %118 = math.tanh %112 : vector<8x128xf32>
    %119 = vector.extract_strided_slice %117 {offsets = [0, 0], sizes = [8, 32], strides = [1, 1]} : vector<8x128xf32> to vector<8x32xf32>
    %120 = vector.extract_strided_slice %117 {offsets = [0, 32], sizes = [8, 32], strides = [1, 1]} : vector<8x128xf32> to vector<8x32xf32>
    %121 = vector.extract_strided_slice %118 {offsets = [0, 64], sizes = [8, 32], strides = [1, 1]} : vector<8x128xf32> to vector<8x32xf32>
    %122 = vector.extract_strided_slice %117 {offsets = [0, 96], sizes = [8, 32], strides = [1, 1]} : vector<8x128xf32> to vector<8x32xf32>
    %123 = arith.mulf %120, %101 : vector<8x32xf32>
    %124 = arith.mulf %119, %121 : vector<8x32xf32>
    %125 = arith.addf %123, %124 : vector<8x32xf32>
    %126 = math.tanh %125 : vector<8x32xf32>
    %127 = arith.mulf %122, %126 : vector<8x32xf32>
    %128 = arith.index_cast %c4_i32 : i32 to index
    %c0_41 = arith.constant 0 : index
    %c0_42 = arith.constant 0 : index
    %129 = vector.load %arg10[%128, %c0_41, %c0_42] : memref<8x8x32xf32, #tpu.memory_space<vmem>>, vector<1x8x32xf32>
    %130 = vector.shape_cast %129 : vector<1x8x32xf32> to vector<8x32xf32>
    %131 = vector.shape_cast %127 : vector<8x32xf32> to vector<1x8x32xf32>
    tpu.vector_store %arg10[%128, %c0_41, %c0_42], %131 {strides = array<i32>} : memref<8x8x32xf32, #tpu.memory_space<vmem>>, vector<1x8x32xf32>,
    %c5_i32 = arith.constant 5 : i32
    %132 = arith.index_cast %c5_i32 : i32 to index
    %c0_43 = arith.constant 0 : index
    %c0_44 = arith.constant 0 : index
    %133 = vector.load %arg11[%132, %c0_43, %c0_44] : memref<8x8x128xf32, #tpu.memory_space<vmem>>, vector<1x8x128xf32>
    %134 = vector.shape_cast %133 : vector<1x8x128xf32> to vector<8x128xf32>
    %cst_45 = arith.constant dense<0.000000e+00> : vector<8x128xf32>
    %135 = tpu.matmul %127, %10, %cst_45 {dimension_numbers = #tpu.dot_dimension_numbers<[1], [0], [0], [1], [0, 0, 1, 1], [], []>} : vector<8x32xf32>, vector<32x128xf32>, vector<8x128xf32> -> vector<8x128xf32>
    %136 = arith.addf %134, %135 : vector<8x128xf32>
    %137 = arith.negf %136 : vector<8x128xf32>
    %138 = math.exp %137 : vector<8x128xf32>
    %cst_46 = arith.constant 1.000000e+00 : f32
    %139 = vector.broadcast %cst_46 : f32 to vector<8x128xf32>
    %140 = arith.addf %139, %138 : vector<8x128xf32>
    %141 = arith.divf %139, %140 : vector<8x128xf32>
    %142 = math.tanh %136 : vector<8x128xf32>
    %143 = vector.extract_strided_slice %141 {offsets = [0, 0], sizes = [8, 32], strides = [1, 1]} : vector<8x128xf32> to vector<8x32xf32>
    %144 = vector.extract_strided_slice %141 {offsets = [0, 32], sizes = [8, 32], strides = [1, 1]} : vector<8x128xf32> to vector<8x32xf32>
    %145 = vector.extract_strided_slice %142 {offsets = [0, 64], sizes = [8, 32], strides = [1, 1]} : vector<8x128xf32> to vector<8x32xf32>
    %146 = vector.extract_strided_slice %141 {offsets = [0, 96], sizes = [8, 32], strides = [1, 1]} : vector<8x128xf32> to vector<8x32xf32>
    %147 = arith.mulf %144, %125 : vector<8x32xf32>
    %148 = arith.mulf %143, %145 : vector<8x32xf32>
    %149 = arith.addf %147, %148 : vector<8x32xf32>
    %150 = math.tanh %149 : vector<8x32xf32>
    %151 = arith.mulf %146, %150 : vector<8x32xf32>
    %152 = arith.index_cast %c5_i32 : i32 to index
    %c0_47 = arith.constant 0 : index
    %c0_48 = arith.constant 0 : index
    %153 = vector.load %arg10[%152, %c0_47, %c0_48] : memref<8x8x32xf32, #tpu.memory_space<vmem>>, vector<1x8x32xf32>
    %154 = vector.shape_cast %153 : vector<1x8x32xf32> to vector<8x32xf32>
    %155 = vector.shape_cast %151 : vector<8x32xf32> to vector<1x8x32xf32>
    tpu.vector_store %arg10[%152, %c0_47, %c0_48], %155 {strides = array<i32>} : memref<8x8x32xf32, #tpu.memory_space<vmem>>, vector<1x8x32xf32>,
    %c6_i32 = arith.constant 6 : i32
    %156 = arith.index_cast %c6_i32 : i32 to index
    %c0_49 = arith.constant 0 : index
    %c0_50 = arith.constant 0 : index
    %157 = vector.load %arg11[%156, %c0_49, %c0_50] : memref<8x8x128xf32, #tpu.memory_space<vmem>>, vector<1x8x128xf32>
    %158 = vector.shape_cast %157 : vector<1x8x128xf32> to vector<8x128xf32>
    %cst_51 = arith.constant dense<0.000000e+00> : vector<8x128xf32>
    %159 = tpu.matmul %151, %10, %cst_51 {dimension_numbers = #tpu.dot_dimension_numbers<[1], [0], [0], [1], [0, 0, 1, 1], [], []>} : vector<8x32xf32>, vector<32x128xf32>, vector<8x128xf32> -> vector<8x128xf32>
    %160 = arith.addf %158, %159 : vector<8x128xf32>
    %161 = arith.negf %160 : vector<8x128xf32>
    %162 = math.exp %161 : vector<8x128xf32>
    %cst_52 = arith.constant 1.000000e+00 : f32
    %163 = vector.broadcast %cst_52 : f32 to vector<8x128xf32>
    %164 = arith.addf %163, %162 : vector<8x128xf32>
    %165 = arith.divf %163, %164 : vector<8x128xf32>
    %166 = math.tanh %160 : vector<8x128xf32>
    %167 = vector.extract_strided_slice %165 {offsets = [0, 0], sizes = [8, 32], strides = [1, 1]} : vector<8x128xf32> to vector<8x32xf32>
    %168 = vector.extract_strided_slice %165 {offsets = [0, 32], sizes = [8, 32], strides = [1, 1]} : vector<8x128xf32> to vector<8x32xf32>
    %169 = vector.extract_strided_slice %166 {offsets = [0, 64], sizes = [8, 32], strides = [1, 1]} : vector<8x128xf32> to vector<8x32xf32>
    %170 = vector.extract_strided_slice %165 {offsets = [0, 96], sizes = [8, 32], strides = [1, 1]} : vector<8x128xf32> to vector<8x32xf32>
    %171 = arith.mulf %168, %149 : vector<8x32xf32>
    %172 = arith.mulf %167, %169 : vector<8x32xf32>
    %173 = arith.addf %171, %172 : vector<8x32xf32>
    %174 = math.tanh %173 : vector<8x32xf32>
    %175 = arith.mulf %170, %174 : vector<8x32xf32>
    %176 = arith.index_cast %c6_i32 : i32 to index
    %c0_53 = arith.constant 0 : index
    %c0_54 = arith.constant 0 : index
    %177 = vector.load %arg10[%176, %c0_53, %c0_54] : memref<8x8x32xf32, #tpu.memory_space<vmem>>, vector<1x8x32xf32>
    %178 = vector.shape_cast %177 : vector<1x8x32xf32> to vector<8x32xf32>
    %179 = vector.shape_cast %175 : vector<8x32xf32> to vector<1x8x32xf32>
    tpu.vector_store %arg10[%176, %c0_53, %c0_54], %179 {strides = array<i32>} : memref<8x8x32xf32, #tpu.memory_space<vmem>>, vector<1x8x32xf32>,
    %c7_i32 = arith.constant 7 : i32
    %180 = arith.index_cast %c7_i32 : i32 to index
    %c0_55 = arith.constant 0 : index
    %c0_56 = arith.constant 0 : index
    %181 = vector.load %arg11[%180, %c0_55, %c0_56] : memref<8x8x128xf32, #tpu.memory_space<vmem>>, vector<1x8x128xf32>
    %182 = vector.shape_cast %181 : vector<1x8x128xf32> to vector<8x128xf32>
    %cst_57 = arith.constant dense<0.000000e+00> : vector<8x128xf32>
    %183 = tpu.matmul %175, %10, %cst_57 {dimension_numbers = #tpu.dot_dimension_numbers<[1], [0], [0], [1], [0, 0, 1, 1], [], []>} : vector<8x32xf32>, vector<32x128xf32>, vector<8x128xf32> -> vector<8x128xf32>
    %184 = arith.addf %182, %183 : vector<8x128xf32>
    %185 = arith.negf %184 : vector<8x128xf32>
    %186 = math.exp %185 : vector<8x128xf32>
    %cst_58 = arith.constant 1.000000e+00 : f32
    %187 = vector.broadcast %cst_58 : f32 to vector<8x128xf32>
    %188 = arith.addf %187, %186 : vector<8x128xf32>
    %189 = arith.divf %187, %188 : vector<8x128xf32>
    %190 = math.tanh %184 : vector<8x128xf32>
    %191 = vector.extract_strided_slice %189 {offsets = [0, 0], sizes = [8, 32], strides = [1, 1]} : vector<8x128xf32> to vector<8x32xf32>
    %192 = vector.extract_strided_slice %189 {offsets = [0, 32], sizes = [8, 32], strides = [1, 1]} : vector<8x128xf32> to vector<8x32xf32>
    %193 = vector.extract_strided_slice %190 {offsets = [0, 64], sizes = [8, 32], strides = [1, 1]} : vector<8x128xf32> to vector<8x32xf32>
    %194 = vector.extract_strided_slice %189 {offsets = [0, 96], sizes = [8, 32], strides = [1, 1]} : vector<8x128xf32> to vector<8x32xf32>
    %195 = arith.mulf %192, %173 : vector<8x32xf32>
    %196 = arith.mulf %191, %193 : vector<8x32xf32>
    %197 = arith.addf %195, %196 : vector<8x32xf32>
    %198 = math.tanh %197 : vector<8x32xf32>
    %199 = arith.mulf %194, %198 : vector<8x32xf32>
    %200 = arith.index_cast %c7_i32 : i32 to index
    %c0_59 = arith.constant 0 : index
    %c0_60 = arith.constant 0 : index
    %201 = vector.load %arg10[%200, %c0_59, %c0_60] : memref<8x8x32xf32, #tpu.memory_space<vmem>>, vector<1x8x32xf32>
    %202 = vector.shape_cast %201 : vector<1x8x32xf32> to vector<8x32xf32>
    %203 = vector.shape_cast %199 : vector<8x32xf32> to vector<1x8x32xf32>
    tpu.vector_store %arg10[%200, %c0_59, %c0_60], %203 {strides = array<i32>} : memref<8x8x32xf32, #tpu.memory_space<vmem>>, vector<1x8x32xf32>,
    %c8_i32 = arith.constant 8 : i32
    %c0_61 = arith.constant 0 : index
    %c0_62 = arith.constant 0 : index
    %c0_63 = arith.constant 0 : index
    %204 = vector.load %arg10[%c0_61, %c0_62, %c0_63] : memref<8x8x32xf32, #tpu.memory_space<vmem>>, vector<8x8x32xf32>
    %205 = vector.shape_cast %204 : vector<8x8x32xf32> to vector<64x32xf32>
    %c0_64 = arith.constant 0 : index
    %c0_65 = arith.constant 0 : index
    %c0_66 = arith.constant 0 : index
    %206 = vector.load %arg5[%c0_64, %c0_65, %c0_66] : memref<1x32x128xf32, #tpu.memory_space<vmem>>, vector<1x32x128xf32>
    %207 = vector.shape_cast %206 : vector<1x32x128xf32> to vector<32x128xf32>
    %cst_67 = arith.constant dense<0.000000e+00> : vector<64x128xf32>
    %208 = tpu.matmul %205, %207, %cst_67 {dimension_numbers = #tpu.dot_dimension_numbers<[1], [0], [0], [1], [0, 0, 1, 1], [], []>} : vector<64x32xf32>, vector<32x128xf32>, vector<64x128xf32> -> vector<64x128xf32>
    %c0_68 = arith.constant 0 : index
    %c0_69 = arith.constant 0 : index
    %c0_70 = arith.constant 0 : index
    %209 = vector.load %arg6[%c0_68, %c0_69, %c0_70] : memref<1x1x128xf32, #tpu.memory_space<vmem>>, vector<1x1x128xf32>
    %210 = vector.shape_cast %209 : vector<1x1x128xf32> to vector<1x128xf32>
    %211 = vector.broadcast %210 : vector<1x128xf32> to vector<64x128xf32>
    %212 = arith.addf %208, %211 : vector<64x128xf32>
    %213 = vector.shape_cast %212 : vector<64x128xf32> to vector<8x8x128xf32>
    %c0_71 = arith.constant 0 : index
    %c0_72 = arith.constant 0 : index
    %c0_73 = arith.constant 0 : index
    %214 = vector.load %arg11[%c0_71, %c0_72, %c0_73] : memref<8x8x128xf32, #tpu.memory_space<vmem>>, vector<8x8x128xf32>
    tpu.vector_store %arg11[%c0_71, %c0_72, %c0_73], %213 {strides = array<i32>} : memref<8x8x128xf32, #tpu.memory_space<vmem>>, vector<8x8x128xf32>,
    %c1 = arith.constant 1 : index
    %c0_74 = arith.constant 0 : index
    %c0_75 = arith.constant 0 : index
    %215 = vector.load %arg4[%c1, %c0_74, %c0_75] : memref<2x32x128xf32, #tpu.memory_space<vmem>>, vector<1x32x128xf32>
    %216 = vector.shape_cast %215 : vector<1x32x128xf32> to vector<32x128xf32>
    %cst_76 = arith.constant 0.000000e+00 : f32
    %217 = vector.broadcast %cst_76 : f32 to vector<8x32xf32>
    %c0_i32_77 = arith.constant 0 : i32
    %218 = arith.index_cast %c0_i32_77 : i32 to index
    %c0_78 = arith.constant 0 : index
    %c0_79 = arith.constant 0 : index
    %219 = vector.load %arg11[%218, %c0_78, %c0_79] : memref<8x8x128xf32, #tpu.memory_space<vmem>>, vector<1x8x128xf32>
    %220 = vector.shape_cast %219 : vector<1x8x128xf32> to vector<8x128xf32>
    %cst_80 = arith.constant dense<0.000000e+00> : vector<8x128xf32>
    %221 = tpu.matmul %217, %216, %cst_80 {dimension_numbers = #tpu.dot_dimension_numbers<[1], [0], [0], [1], [0, 0, 1, 1], [], []>} : vector<8x32xf32>, vector<32x128xf32>, vector<8x128xf32> -> vector<8x128xf32>
    %222 = arith.addf %220, %221 : vector<8x128xf32>
    %223 = arith.negf %222 : vector<8x128xf32>
    %224 = math.exp %223 : vector<8x128xf32>
    %cst_81 = arith.constant 1.000000e+00 : f32
    %225 = vector.broadcast %cst_81 : f32 to vector<8x128xf32>
    %226 = arith.addf %225, %224 : vector<8x128xf32>
    %227 = arith.divf %225, %226 : vector<8x128xf32>
    %228 = math.tanh %222 : vector<8x128xf32>
    %229 = vector.extract_strided_slice %227 {offsets = [0, 0], sizes = [8, 32], strides = [1, 1]} : vector<8x128xf32> to vector<8x32xf32>
    %230 = vector.extract_strided_slice %227 {offsets = [0, 32], sizes = [8, 32], strides = [1, 1]} : vector<8x128xf32> to vector<8x32xf32>
    %231 = vector.extract_strided_slice %228 {offsets = [0, 64], sizes = [8, 32], strides = [1, 1]} : vector<8x128xf32> to vector<8x32xf32>
    %232 = vector.extract_strided_slice %227 {offsets = [0, 96], sizes = [8, 32], strides = [1, 1]} : vector<8x128xf32> to vector<8x32xf32>
    %233 = arith.mulf %230, %217 : vector<8x32xf32>
    %234 = arith.mulf %229, %231 : vector<8x32xf32>
    %235 = arith.addf %233, %234 : vector<8x32xf32>
    %236 = math.tanh %235 : vector<8x32xf32>
    %237 = arith.mulf %232, %236 : vector<8x32xf32>
    %238 = arith.index_cast %c0_i32_77 : i32 to index
    %c0_82 = arith.constant 0 : index
    %c0_83 = arith.constant 0 : index
    %239 = vector.load %arg10[%238, %c0_82, %c0_83] : memref<8x8x32xf32, #tpu.memory_space<vmem>>, vector<1x8x32xf32>
    %240 = vector.shape_cast %239 : vector<1x8x32xf32> to vector<8x32xf32>
    %241 = vector.shape_cast %237 : vector<8x32xf32> to vector<1x8x32xf32>
    tpu.vector_store %arg10[%238, %c0_82, %c0_83], %241 {strides = array<i32>} : memref<8x8x32xf32, #tpu.memory_space<vmem>>, vector<1x8x32xf32>,
    %c1_i32_84 = arith.constant 1 : i32
    %242 = arith.index_cast %c1_i32_84 : i32 to index
    %c0_85 = arith.constant 0 : index
    %c0_86 = arith.constant 0 : index
    %243 = vector.load %arg11[%242, %c0_85, %c0_86] : memref<8x8x128xf32, #tpu.memory_space<vmem>>, vector<1x8x128xf32>
    %244 = vector.shape_cast %243 : vector<1x8x128xf32> to vector<8x128xf32>
    %cst_87 = arith.constant dense<0.000000e+00> : vector<8x128xf32>
    %245 = tpu.matmul %237, %216, %cst_87 {dimension_numbers = #tpu.dot_dimension_numbers<[1], [0], [0], [1], [0, 0, 1, 1], [], []>} : vector<8x32xf32>, vector<32x128xf32>, vector<8x128xf32> -> vector<8x128xf32>
    %246 = arith.addf %244, %245 : vector<8x128xf32>
    %247 = arith.negf %246 : vector<8x128xf32>
    %248 = math.exp %247 : vector<8x128xf32>
    %cst_88 = arith.constant 1.000000e+00 : f32
    %249 = vector.broadcast %cst_88 : f32 to vector<8x128xf32>
    %250 = arith.addf %249, %248 : vector<8x128xf32>
    %251 = arith.divf %249, %250 : vector<8x128xf32>
    %252 = math.tanh %246 : vector<8x128xf32>
    %253 = vector.extract_strided_slice %251 {offsets = [0, 0], sizes = [8, 32], strides = [1, 1]} : vector<8x128xf32> to vector<8x32xf32>
    %254 = vector.extract_strided_slice %251 {offsets = [0, 32], sizes = [8, 32], strides = [1, 1]} : vector<8x128xf32> to vector<8x32xf32>
    %255 = vector.extract_strided_slice %252 {offsets = [0, 64], sizes = [8, 32], strides = [1, 1]} : vector<8x128xf32> to vector<8x32xf32>
    %256 = vector.extract_strided_slice %251 {offsets = [0, 96], sizes = [8, 32], strides = [1, 1]} : vector<8x128xf32> to vector<8x32xf32>
    %257 = arith.mulf %254, %235 : vector<8x32xf32>
    %258 = arith.mulf %253, %255 : vector<8x32xf32>
    %259 = arith.addf %257, %258 : vector<8x32xf32>
    %260 = math.tanh %259 : vector<8x32xf32>
    %261 = arith.mulf %256, %260 : vector<8x32xf32>
    %262 = arith.index_cast %c1_i32_84 : i32 to index
    %c0_89 = arith.constant 0 : index
    %c0_90 = arith.constant 0 : index
    %263 = vector.load %arg10[%262, %c0_89, %c0_90] : memref<8x8x32xf32, #tpu.memory_space<vmem>>, vector<1x8x32xf32>
    %264 = vector.shape_cast %263 : vector<1x8x32xf32> to vector<8x32xf32>
    %265 = vector.shape_cast %261 : vector<8x32xf32> to vector<1x8x32xf32>
    tpu.vector_store %arg10[%262, %c0_89, %c0_90], %265 {strides = array<i32>} : memref<8x8x32xf32, #tpu.memory_space<vmem>>, vector<1x8x32xf32>,
    %c2_i32_91 = arith.constant 2 : i32
    %266 = arith.index_cast %c2_i32_91 : i32 to index
    %c0_92 = arith.constant 0 : index
    %c0_93 = arith.constant 0 : index
    %267 = vector.load %arg11[%266, %c0_92, %c0_93] : memref<8x8x128xf32, #tpu.memory_space<vmem>>, vector<1x8x128xf32>
    %268 = vector.shape_cast %267 : vector<1x8x128xf32> to vector<8x128xf32>
    %cst_94 = arith.constant dense<0.000000e+00> : vector<8x128xf32>
    %269 = tpu.matmul %261, %216, %cst_94 {dimension_numbers = #tpu.dot_dimension_numbers<[1], [0], [0], [1], [0, 0, 1, 1], [], []>} : vector<8x32xf32>, vector<32x128xf32>, vector<8x128xf32> -> vector<8x128xf32>
    %270 = arith.addf %268, %269 : vector<8x128xf32>
    %271 = arith.negf %270 : vector<8x128xf32>
    %272 = math.exp %271 : vector<8x128xf32>
    %cst_95 = arith.constant 1.000000e+00 : f32
    %273 = vector.broadcast %cst_95 : f32 to vector<8x128xf32>
    %274 = arith.addf %273, %272 : vector<8x128xf32>
    %275 = arith.divf %273, %274 : vector<8x128xf32>
    %276 = math.tanh %270 : vector<8x128xf32>
    %277 = vector.extract_strided_slice %275 {offsets = [0, 0], sizes = [8, 32], strides = [1, 1]} : vector<8x128xf32> to vector<8x32xf32>
    %278 = vector.extract_strided_slice %275 {offsets = [0, 32], sizes = [8, 32], strides = [1, 1]} : vector<8x128xf32> to vector<8x32xf32>
    %279 = vector.extract_strided_slice %276 {offsets = [0, 64], sizes = [8, 32], strides = [1, 1]} : vector<8x128xf32> to vector<8x32xf32>
    %280 = vector.extract_strided_slice %275 {offsets = [0, 96], sizes = [8, 32], strides = [1, 1]} : vector<8x128xf32> to vector<8x32xf32>
    %281 = arith.mulf %278, %259 : vector<8x32xf32>
    %282 = arith.mulf %277, %279 : vector<8x32xf32>
    %283 = arith.addf %281, %282 : vector<8x32xf32>
    %284 = math.tanh %283 : vector<8x32xf32>
    %285 = arith.mulf %280, %284 : vector<8x32xf32>
    %286 = arith.index_cast %c2_i32_91 : i32 to index
    %c0_96 = arith.constant 0 : index
    %c0_97 = arith.constant 0 : index
    %287 = vector.load %arg10[%286, %c0_96, %c0_97] : memref<8x8x32xf32, #tpu.memory_space<vmem>>, vector<1x8x32xf32>
    %288 = vector.shape_cast %287 : vector<1x8x32xf32> to vector<8x32xf32>
    %289 = vector.shape_cast %285 : vector<8x32xf32> to vector<1x8x32xf32>
    tpu.vector_store %arg10[%286, %c0_96, %c0_97], %289 {strides = array<i32>} : memref<8x8x32xf32, #tpu.memory_space<vmem>>, vector<1x8x32xf32>,
    %c3_i32_98 = arith.constant 3 : i32
    %290 = arith.index_cast %c3_i32_98 : i32 to index
    %c0_99 = arith.constant 0 : index
    %c0_100 = arith.constant 0 : index
    %291 = vector.load %arg11[%290, %c0_99, %c0_100] : memref<8x8x128xf32, #tpu.memory_space<vmem>>, vector<1x8x128xf32>
    %292 = vector.shape_cast %291 : vector<1x8x128xf32> to vector<8x128xf32>
    %cst_101 = arith.constant dense<0.000000e+00> : vector<8x128xf32>
    %293 = tpu.matmul %285, %216, %cst_101 {dimension_numbers = #tpu.dot_dimension_numbers<[1], [0], [0], [1], [0, 0, 1, 1], [], []>} : vector<8x32xf32>, vector<32x128xf32>, vector<8x128xf32> -> vector<8x128xf32>
    %294 = arith.addf %292, %293 : vector<8x128xf32>
    %295 = arith.negf %294 : vector<8x128xf32>
    %296 = math.exp %295 : vector<8x128xf32>
    %cst_102 = arith.constant 1.000000e+00 : f32
    %297 = vector.broadcast %cst_102 : f32 to vector<8x128xf32>
    %298 = arith.addf %297, %296 : vector<8x128xf32>
    %299 = arith.divf %297, %298 : vector<8x128xf32>
    %300 = math.tanh %294 : vector<8x128xf32>
    %301 = vector.extract_strided_slice %299 {offsets = [0, 0], sizes = [8, 32], strides = [1, 1]} : vector<8x128xf32> to vector<8x32xf32>
    %302 = vector.extract_strided_slice %299 {offsets = [0, 32], sizes = [8, 32], strides = [1, 1]} : vector<8x128xf32> to vector<8x32xf32>
    %303 = vector.extract_strided_slice %300 {offsets = [0, 64], sizes = [8, 32], strides = [1, 1]} : vector<8x128xf32> to vector<8x32xf32>
    %304 = vector.extract_strided_slice %299 {offsets = [0, 96], sizes = [8, 32], strides = [1, 1]} : vector<8x128xf32> to vector<8x32xf32>
    %305 = arith.mulf %302, %283 : vector<8x32xf32>
    %306 = arith.mulf %301, %303 : vector<8x32xf32>
    %307 = arith.addf %305, %306 : vector<8x32xf32>
    %308 = math.tanh %307 : vector<8x32xf32>
    %309 = arith.mulf %304, %308 : vector<8x32xf32>
    %310 = arith.index_cast %c3_i32_98 : i32 to index
    %c0_103 = arith.constant 0 : index
    %c0_104 = arith.constant 0 : index
    %311 = vector.load %arg10[%310, %c0_103, %c0_104] : memref<8x8x32xf32, #tpu.memory_space<vmem>>, vector<1x8x32xf32>
    %312 = vector.shape_cast %311 : vector<1x8x32xf32> to vector<8x32xf32>
    %313 = vector.shape_cast %309 : vector<8x32xf32> to vector<1x8x32xf32>
    tpu.vector_store %arg10[%310, %c0_103, %c0_104], %313 {strides = array<i32>} : memref<8x8x32xf32, #tpu.memory_space<vmem>>, vector<1x8x32xf32>,
    %c4_i32_105 = arith.constant 4 : i32
    %314 = arith.index_cast %c4_i32_105 : i32 to index
    %c0_106 = arith.constant 0 : index
    %c0_107 = arith.constant 0 : index
    %315 = vector.load %arg11[%314, %c0_106, %c0_107] : memref<8x8x128xf32, #tpu.memory_space<vmem>>, vector<1x8x128xf32>
    %316 = vector.shape_cast %315 : vector<1x8x128xf32> to vector<8x128xf32>
    %cst_108 = arith.constant dense<0.000000e+00> : vector<8x128xf32>
    %317 = tpu.matmul %309, %216, %cst_108 {dimension_numbers = #tpu.dot_dimension_numbers<[1], [0], [0], [1], [0, 0, 1, 1], [], []>} : vector<8x32xf32>, vector<32x128xf32>, vector<8x128xf32> -> vector<8x128xf32>
    %318 = arith.addf %316, %317 : vector<8x128xf32>
    %319 = arith.negf %318 : vector<8x128xf32>
    %320 = math.exp %319 : vector<8x128xf32>
    %cst_109 = arith.constant 1.000000e+00 : f32
    %321 = vector.broadcast %cst_109 : f32 to vector<8x128xf32>
    %322 = arith.addf %321, %320 : vector<8x128xf32>
    %323 = arith.divf %321, %322 : vector<8x128xf32>
    %324 = math.tanh %318 : vector<8x128xf32>
    %325 = vector.extract_strided_slice %323 {offsets = [0, 0], sizes = [8, 32], strides = [1, 1]} : vector<8x128xf32> to vector<8x32xf32>
    %326 = vector.extract_strided_slice %323 {offsets = [0, 32], sizes = [8, 32], strides = [1, 1]} : vector<8x128xf32> to vector<8x32xf32>
    %327 = vector.extract_strided_slice %324 {offsets = [0, 64], sizes = [8, 32], strides = [1, 1]} : vector<8x128xf32> to vector<8x32xf32>
    %328 = vector.extract_strided_slice %323 {offsets = [0, 96], sizes = [8, 32], strides = [1, 1]} : vector<8x128xf32> to vector<8x32xf32>
    %329 = arith.mulf %326, %307 : vector<8x32xf32>
    %330 = arith.mulf %325, %327 : vector<8x32xf32>
    %331 = arith.addf %329, %330 : vector<8x32xf32>
    %332 = math.tanh %331 : vector<8x32xf32>
    %333 = arith.mulf %328, %332 : vector<8x32xf32>
    %334 = arith.index_cast %c4_i32_105 : i32 to index
    %c0_110 = arith.constant 0 : index
    %c0_111 = arith.constant 0 : index
    %335 = vector.load %arg10[%334, %c0_110, %c0_111] : memref<8x8x32xf32, #tpu.memory_space<vmem>>, vector<1x8x32xf32>
    %336 = vector.shape_cast %335 : vector<1x8x32xf32> to vector<8x32xf32>
    %337 = vector.shape_cast %333 : vector<8x32xf32> to vector<1x8x32xf32>
    tpu.vector_store %arg10[%334, %c0_110, %c0_111], %337 {strides = array<i32>} : memref<8x8x32xf32, #tpu.memory_space<vmem>>, vector<1x8x32xf32>,
    %c5_i32_112 = arith.constant 5 : i32
    %338 = arith.index_cast %c5_i32_112 : i32 to index
    %c0_113 = arith.constant 0 : index
    %c0_114 = arith.constant 0 : index
    %339 = vector.load %arg11[%338, %c0_113, %c0_114] : memref<8x8x128xf32, #tpu.memory_space<vmem>>, vector<1x8x128xf32>
    %340 = vector.shape_cast %339 : vector<1x8x128xf32> to vector<8x128xf32>
    %cst_115 = arith.constant dense<0.000000e+00> : vector<8x128xf32>
    %341 = tpu.matmul %333, %216, %cst_115 {dimension_numbers = #tpu.dot_dimension_numbers<[1], [0], [0], [1], [0, 0, 1, 1], [], []>} : vector<8x32xf32>, vector<32x128xf32>, vector<8x128xf32> -> vector<8x128xf32>
    %342 = arith.addf %340, %341 : vector<8x128xf32>
    %343 = arith.negf %342 : vector<8x128xf32>
    %344 = math.exp %343 : vector<8x128xf32>
    %cst_116 = arith.constant 1.000000e+00 : f32
    %345 = vector.broadcast %cst_116 : f32 to vector<8x128xf32>
    %346 = arith.addf %345, %344 : vector<8x128xf32>
    %347 = arith.divf %345, %346 : vector<8x128xf32>
    %348 = math.tanh %342 : vector<8x128xf32>
    %349 = vector.extract_strided_slice %347 {offsets = [0, 0], sizes = [8, 32], strides = [1, 1]} : vector<8x128xf32> to vector<8x32xf32>
    %350 = vector.extract_strided_slice %347 {offsets = [0, 32], sizes = [8, 32], strides = [1, 1]} : vector<8x128xf32> to vector<8x32xf32>
    %351 = vector.extract_strided_slice %348 {offsets = [0, 64], sizes = [8, 32], strides = [1, 1]} : vector<8x128xf32> to vector<8x32xf32>
    %352 = vector.extract_strided_slice %347 {offsets = [0, 96], sizes = [8, 32], strides = [1, 1]} : vector<8x128xf32> to vector<8x32xf32>
    %353 = arith.mulf %350, %331 : vector<8x32xf32>
    %354 = arith.mulf %349, %351 : vector<8x32xf32>
    %355 = arith.addf %353, %354 : vector<8x32xf32>
    %356 = math.tanh %355 : vector<8x32xf32>
    %357 = arith.mulf %352, %356 : vector<8x32xf32>
    %358 = arith.index_cast %c5_i32_112 : i32 to index
    %c0_117 = arith.constant 0 : index
    %c0_118 = arith.constant 0 : index
    %359 = vector.load %arg10[%358, %c0_117, %c0_118] : memref<8x8x32xf32, #tpu.memory_space<vmem>>, vector<1x8x32xf32>
    %360 = vector.shape_cast %359 : vector<1x8x32xf32> to vector<8x32xf32>
    %361 = vector.shape_cast %357 : vector<8x32xf32> to vector<1x8x32xf32>
    tpu.vector_store %arg10[%358, %c0_117, %c0_118], %361 {strides = array<i32>} : memref<8x8x32xf32, #tpu.memory_space<vmem>>, vector<1x8x32xf32>,
    %c6_i32_119 = arith.constant 6 : i32
    %362 = arith.index_cast %c6_i32_119 : i32 to index
    %c0_120 = arith.constant 0 : index
    %c0_121 = arith.constant 0 : index
    %363 = vector.load %arg11[%362, %c0_120, %c0_121] : memref<8x8x128xf32, #tpu.memory_space<vmem>>, vector<1x8x128xf32>
    %364 = vector.shape_cast %363 : vector<1x8x128xf32> to vector<8x128xf32>
    %cst_122 = arith.constant dense<0.000000e+00> : vector<8x128xf32>
    %365 = tpu.matmul %357, %216, %cst_122 {dimension_numbers = #tpu.dot_dimension_numbers<[1], [0], [0], [1], [0, 0, 1, 1], [], []>} : vector<8x32xf32>, vector<32x128xf32>, vector<8x128xf32> -> vector<8x128xf32>
    %366 = arith.addf %364, %365 : vector<8x128xf32>
    %367 = arith.negf %366 : vector<8x128xf32>
    %368 = math.exp %367 : vector<8x128xf32>
    %cst_123 = arith.constant 1.000000e+00 : f32
    %369 = vector.broadcast %cst_123 : f32 to vector<8x128xf32>
    %370 = arith.addf %369, %368 : vector<8x128xf32>
    %371 = arith.divf %369, %370 : vector<8x128xf32>
    %372 = math.tanh %366 : vector<8x128xf32>
    %373 = vector.extract_strided_slice %371 {offsets = [0, 0], sizes = [8, 32], strides = [1, 1]} : vector<8x128xf32> to vector<8x32xf32>
    %374 = vector.extract_strided_slice %371 {offsets = [0, 32], sizes = [8, 32], strides = [1, 1]} : vector<8x128xf32> to vector<8x32xf32>
    %375 = vector.extract_strided_slice %372 {offsets = [0, 64], sizes = [8, 32], strides = [1, 1]} : vector<8x128xf32> to vector<8x32xf32>
    %376 = vector.extract_strided_slice %371 {offsets = [0, 96], sizes = [8, 32], strides = [1, 1]} : vector<8x128xf32> to vector<8x32xf32>
    %377 = arith.mulf %374, %355 : vector<8x32xf32>
    %378 = arith.mulf %373, %375 : vector<8x32xf32>
    %379 = arith.addf %377, %378 : vector<8x32xf32>
    %380 = math.tanh %379 : vector<8x32xf32>
    %381 = arith.mulf %376, %380 : vector<8x32xf32>
    %382 = arith.index_cast %c6_i32_119 : i32 to index
    %c0_124 = arith.constant 0 : index
    %c0_125 = arith.constant 0 : index
    %383 = vector.load %arg10[%382, %c0_124, %c0_125] : memref<8x8x32xf32, #tpu.memory_space<vmem>>, vector<1x8x32xf32>
    %384 = vector.shape_cast %383 : vector<1x8x32xf32> to vector<8x32xf32>
    %385 = vector.shape_cast %381 : vector<8x32xf32> to vector<1x8x32xf32>
    tpu.vector_store %arg10[%382, %c0_124, %c0_125], %385 {strides = array<i32>} : memref<8x8x32xf32, #tpu.memory_space<vmem>>, vector<1x8x32xf32>,
    %c7_i32_126 = arith.constant 7 : i32
    %386 = arith.index_cast %c7_i32_126 : i32 to index
    %c0_127 = arith.constant 0 : index
    %c0_128 = arith.constant 0 : index
    %387 = vector.load %arg11[%386, %c0_127, %c0_128] : memref<8x8x128xf32, #tpu.memory_space<vmem>>, vector<1x8x128xf32>
    %388 = vector.shape_cast %387 : vector<1x8x128xf32> to vector<8x128xf32>
    %cst_129 = arith.constant dense<0.000000e+00> : vector<8x128xf32>
    %389 = tpu.matmul %381, %216, %cst_129 {dimension_numbers = #tpu.dot_dimension_numbers<[1], [0], [0], [1], [0, 0, 1, 1], [], []>} : vector<8x32xf32>, vector<32x128xf32>, vector<8x128xf32> -> vector<8x128xf32>
    %390 = arith.addf %388, %389 : vector<8x128xf32>
    %391 = arith.negf %390 : vector<8x128xf32>
    %392 = math.exp %391 : vector<8x128xf32>
    %cst_130 = arith.constant 1.000000e+00 : f32
    %393 = vector.broadcast %cst_130 : f32 to vector<8x128xf32>
    %394 = arith.addf %393, %392 : vector<8x128xf32>
    %395 = arith.divf %393, %394 : vector<8x128xf32>
    %396 = math.tanh %390 : vector<8x128xf32>
    %397 = vector.extract_strided_slice %395 {offsets = [0, 0], sizes = [8, 32], strides = [1, 1]} : vector<8x128xf32> to vector<8x32xf32>
    %398 = vector.extract_strided_slice %395 {offsets = [0, 32], sizes = [8, 32], strides = [1, 1]} : vector<8x128xf32> to vector<8x32xf32>
    %399 = vector.extract_strided_slice %396 {offsets = [0, 64], sizes = [8, 32], strides = [1, 1]} : vector<8x128xf32> to vector<8x32xf32>
    %400 = vector.extract_strided_slice %395 {offsets = [0, 96], sizes = [8, 32], strides = [1, 1]} : vector<8x128xf32> to vector<8x32xf32>
    %401 = arith.mulf %398, %379 : vector<8x32xf32>
    %402 = arith.mulf %397, %399 : vector<8x32xf32>
    %403 = arith.addf %401, %402 : vector<8x32xf32>
    %404 = math.tanh %403 : vector<8x32xf32>
    %405 = arith.mulf %400, %404 : vector<8x32xf32>
    %406 = arith.index_cast %c7_i32_126 : i32 to index
    %c0_131 = arith.constant 0 : index
    %c0_132 = arith.constant 0 : index
    %407 = vector.load %arg10[%406, %c0_131, %c0_132] : memref<8x8x32xf32, #tpu.memory_space<vmem>>, vector<1x8x32xf32>
    %408 = vector.shape_cast %407 : vector<1x8x32xf32> to vector<8x32xf32>
    %409 = vector.shape_cast %405 : vector<8x32xf32> to vector<1x8x32xf32>
    tpu.vector_store %arg10[%406, %c0_131, %c0_132], %409 {strides = array<i32>} : memref<8x8x32xf32, #tpu.memory_space<vmem>>, vector<1x8x32xf32>,
    %c8_i32_133 = arith.constant 8 : i32
    %c4 = arith.constant 4 : index
    %c0_134 = arith.constant 0 : index
    %c0_135 = arith.constant 0 : index
    %410 = vector.load %arg10[%c4, %c0_134, %c0_135] : memref<8x8x32xf32, #tpu.memory_space<vmem>>, vector<4x8x32xf32>
    %411 = vector.shape_cast %410 : vector<4x8x32xf32> to vector<32x32xf32>
    %c0_136 = arith.constant 0 : index
    %c0_137 = arith.constant 0 : index
    %412 = vector.load %arg7[%c0_136, %c0_137] : memref<32x128xf32, #tpu.memory_space<vmem>>, vector<32x128xf32>
    %cst_138 = arith.constant dense<0.000000e+00> : vector<32x128xf32>
    %413 = tpu.matmul %411, %412, %cst_138 {dimension_numbers = #tpu.dot_dimension_numbers<[1], [0], [0], [1], [0, 0, 1, 1], [], []>} : vector<32x32xf32>, vector<32x128xf32>, vector<32x128xf32> -> vector<32x128xf32>
    %c0_139 = arith.constant 0 : index
    %c0_140 = arith.constant 0 : index
    %414 = vector.load %arg8[%c0_139, %c0_140] : memref<1x128xf32, #tpu.memory_space<vmem>>, vector<1x128xf32>
    %415 = vector.broadcast %414 : vector<1x128xf32> to vector<32x128xf32>
    %416 = arith.addf %413, %415 : vector<32x128xf32>
    %417 = vector.shape_cast %416 : vector<32x128xf32> to vector<4x8x128xf32>
    %c0_141 = arith.constant 0 : index
    %c0_142 = arith.constant 0 : index
    %c0_143 = arith.constant 0 : index
    %418 = vector.load %arg9[%c0_141, %c0_142, %c0_143] : memref<4x8x128xf32, #tpu.memory_space<vmem>>, vector<4x8x128xf32>
    tpu.vector_store %arg9[%c0_141, %c0_142, %c0_143], %417 {strides = array<i32>} : memref<4x8x128xf32, #tpu.memory_space<vmem>>, vector<4x8x128xf32>,
    return
  }
  func.func @transform_0(%arg0: i32) -> (i32, i32, i32) {
    %c0_i32 = arith.constant 0 : i32
    %c0_i32_0 = arith.constant 0 : i32
    %c0_i32_1 = arith.constant 0 : i32
    return %c0_i32, %arg0, %c0_i32_0 : i32, i32, i32
  }
  func.func @transform_1(%arg0: i32) -> (i32, i32) {
    %c0_i32 = arith.constant 0 : i32
    %c0_i32_0 = arith.constant 0 : i32
    %c0_i32_1 = arith.constant 0 : i32
    return %c0_i32, %c0_i32_0 : i32, i32
  }
  func.func @transform_2(%arg0: i32) -> (i32, i32) {
    %c0_i32 = arith.constant 0 : i32
    %c0_i32_0 = arith.constant 0 : i32
    %c0_i32_1 = arith.constant 0 : i32
    return %c0_i32, %c0_i32_0 : i32, i32
  }
  func.func @transform_3(%arg0: i32) -> (i32, i32, i32) {
    %c0_i32 = arith.constant 0 : i32
    %c0_i32_0 = arith.constant 0 : i32
    %c0_i32_1 = arith.constant 0 : i32
    %c0_i32_2 = arith.constant 0 : i32
    return %c0_i32, %c0_i32_0, %c0_i32_1 : i32, i32, i32
  }
  func.func @transform_4(%arg0: i32) -> (i32, i32, i32) {
    %c0_i32 = arith.constant 0 : i32
    %c0_i32_0 = arith.constant 0 : i32
    %c0_i32_1 = arith.constant 0 : i32
    %c0_i32_2 = arith.constant 0 : i32
    return %c0_i32, %c0_i32_0, %c0_i32_1 : i32, i32, i32
  }
  func.func @transform_5(%arg0: i32) -> (i32, i32, i32) {
    %c0_i32 = arith.constant 0 : i32
    %c0_i32_0 = arith.constant 0 : i32
    %c0_i32_1 = arith.constant 0 : i32
    %c0_i32_2 = arith.constant 0 : i32
    return %c0_i32, %c0_i32_0, %c0_i32_1 : i32, i32, i32
  }
  func.func @transform_6(%arg0: i32) -> (i32, i32) {
    %c0_i32 = arith.constant 0 : i32
    %c0_i32_0 = arith.constant 0 : i32
    %c0_i32_1 = arith.constant 0 : i32
    return %c0_i32, %c0_i32_0 : i32, i32
  }
  func.func @transform_7(%arg0: i32) -> (i32, i32) {
    %c0_i32 = arith.constant 0 : i32
    %c0_i32_0 = arith.constant 0 : i32
    %c0_i32_1 = arith.constant 0 : i32
    return %c0_i32, %c0_i32_0 : i32, i32
  }
  func.func @transform_8(%arg0: i32) -> (i32, i32, i32) {
    %c0_i32 = arith.constant 0 : i32
    %c0_i32_0 = arith.constant 0 : i32
    %c0_i32_1 = arith.constant 0 : i32
    return %c0_i32, %arg0, %c0_i32_0 : i32, i32, i32
  }
}

</mosaic_0001>

<bundles_post_ra>
// kernel: lstm_linear_forward.1
= control target key start
LH: loop header
LB: loop body
LE: loop exit
PB: predicated region body
PF: predicated region fallthrough
CT: control target
= control target key end

     0   :  { %13 = vsyncpa [#allocation5], 0  ;;  %s2694_s27 = smov [#allocation4]   ;;  %s3182_s0 = inlined_call_operand.vmem [shape: f32[8,8,8], index: 0, kind: input, shape index: {}]   ;;  %s3183_s1 = inlined_call_operand.vmem [shape: f32[8,128], index: 1, kind: input, shape index: {}]   ;;  %s3184_s2 = inlined_call_operand.vmem [shape: f32[1,128], index: 2, kind: input, shape index: {}]   ;;  %s3185_s3 = inlined_call_operand.vmem [shape: f32[2,32,128], index: 3, kind: input, shape index: {}]   ;;  %s3186_s4 = inlined_call_operand.vmem [shape: f32[1,32,128], index: 4, kind: input, shape index: {}]   ;;  %s3187_s5 = inlined_call_operand.vmem [shape: f32[1,1,128], index: 5, kind: input, shape index: {}]   ;;  %s3188_s6 = inlined_call_operand.hbm [shape: f32[32,128], index: 6, kind: input, shape index: {}]   ;;  %s3189_s7 = inlined_call_operand.vmem [shape: f32[1,128], index: 7, kind: input, shape index: {}]   ;;  %s3190_s8 = inlined_call_operand.vmem [shape: f32[4,8,128], index: 8, kind: output, shape index: {}]  }
   0x1   :  { %s31_s28 = sshll.u32 %s2694_s27, 4  ;;  %s32_s28 = int_to_ptr.vmem [resolvable:$true] %s31_s28 }
   0x2   :  { %s2680_s29 = scalar_lea.vmem %s32_s28, 512  ;;  %p2685_p1 = scmp.lt.s32.totalorder %s32_s28, %s32_s28 }
   0x3   :  { %p2681_p0 = scmp.ne.s32.totalorder %s32_s28, %s2680_s29  ;;  %p2686_p2 = scmp.lt.s32.totalorder %s2680_s29, %s2680_s29 }
   0x5   :  { %p2687_p3 = por %p2686_p2, %p2685_p1 }
   0x7   :  { %p2688_p4 = pnand %p2687_p3, %p2681_p0 }
   0x9   :  { %2691 = shalt.err (!%p2688_p4)
}
   0xa   :  { %s2695_s30 = smov 128   ;;  %s2696_s9 = smov 8  }
   0xb   :  { %37 = dma.hbm_to_vmem [thread:$0]  %s3188_s6, 512, %s32_s28, [#allocation5], %s2695_s30, %s2695_s30, %s2696_s9  }
   0xc   :  { %2692 = dma.done.wait [#allocation5], 512  }
   0xd   :  { %2693 = vsyncadd [#allocation5], 4294966784  ;;  %vm59_vm0 = vcmask 64512   ;;  %v51_v0 = vld [vmem:[%s3183_s1] sm:$0xff]  ;;  %v48_v2 = vld [vmem:[%s3182_s0 + $0x28] sm:$0xff]  ;;  %v2697_v5 = vmov 0.0  }
   0xe   :  { %v47_v1 = vld [vmem:[%s3182_s0 + $0x20] sm:$0xff]  ;;  %2535 = vmatprep.subr.mxu1 %v51_v0  ;;  %v2762_v3 = vld [vmem:[%s3185_s3 + $0x18] sm:$0xff]  ;;  %2311 = vmatprep.subr.mxu0 %v51_v0  ;;  %v44_v6 = vld [vmem:[%s3182_s0 + $0x8] sm:$0xff]  ;;  %vm2698_vm1 = vmmov 0   ;;  %s2699_s12 = smov 64   ;;  %vm202_vm2 = vcmask 261120  }
   0xf   :  { %2319 = vmatprep.mubr.msk.f32.mxu1 %vm59_vm0, %v47_v1  ;;  %2536 = vmatpush3.msra.mxu1 %v51_v0  ;;  %v43_v4 = vld [vmem:[%s3182_s0] sm:$0xff]  ;;  %v49_v7 = vld [vmem:[%s3182_s0 + $0x30] sm:$0xff]  ;;  %v50_v9 = vld [vmem:[%s3182_s0 + $0x38] sm:$0xff] }
  0x10   :  { %2320 = vmatmul.mubr.msk.f32.vlgmr.msra.gmra.mxu1 %vm59_vm0, %v48_v2  ;;  %2325 = vmatprep.subr.mxu1 %v2697_v5  ;;  %v2779_v8 = vld [vmem:[%s3185_s3 + $0x10] sm:$0xff]  ;;  %v2791_v10 = vld [vmem:[%s3185_s3 + $0x8] sm:$0xff]  ;;  %v2800_v11 = vld [vmem:[%s3185_s3] sm:$0xff] }
  0x11   :  { %2326 = vmatpush3.msra.mxu1 %v2762_v3  ;;  %2312 = vmatpush3.msra.mxu0 %v51_v0  ;;  %v2836_v17 = vld [vmem:[%s3184_s2] ss:$0 sm:$0xff]  ;;  %s2700_s2 = smov 32   ;;  %v45_v51 = vld [vmem:[%s3182_s0 + $0x10] sm:$0xff]  ;;  %v46_v52 = vld [vmem:[%s3182_s0 + $0x18] sm:$0xff] }
  0x12   :  { %2313 = vmatprep.mubr.msk.f32.mxu0 %vm59_vm0, %v43_v4  ;;  %2327 = vmatprep.subr.mxu1 %v2697_v5 }
  0x13   :  { %2314 = vmatmul.mubr.msk.f32.vlgmr.msra.gmra.mxu0 %vm59_vm0, %v44_v6  ;;  %2322 = vmatprep.mubr.msk.f32.mxu1 %vm59_vm0, %v49_v7 }
  0x14   :  { %2328 = vmatpush3.msra.mxu1 %v2779_v8  ;;  %2347 = vmatprep.subr.mxu0 %v2697_v5 }
  0x15   :  { %2323 = vmatmul.mubr.msk.f32.gmra.mxu1 %vm59_vm0, %v50_v9  ;;  %2329 = vmatprep.subr.mxu1 %v2697_v5 }
  0x16   :  { %2330 = vmatpush3.msra.mxu1 %v2791_v10  ;;  %2333 = vmatprep.mubr.msk.f32.mxu1 %vm2698_vm1, %v2697_v5 }
  0x17   :  { %2331 = vmatprep.subr.mxu1 %v2697_v5  ;;  %2348 = vmatpush3.msra.mxu0 %v2762_v3 }
  0x18   :  { %2332 = vmatpush3.msra.mxu1 %v2800_v11  ;;  %2349 = vmatprep.subr.mxu0 %v2697_v5 }
  0x19   :  { %2334 = vmatmul.mubr.f32.vlgmr.msra.gmra.mxu1 %v2697_v5  ;;  %2336 = vmatprep.subr.mxu1 %v2697_v5 }
  0x1a   :  { %2337 = vmatpush3.msra.mxu1 %v2762_v3  ;;  %2344 = vmatprep.mubr.msk.f32.mxu1 %vm2698_vm1, %v2697_v5 }
  0x1b   :  { %2338 = vmatprep.subr.mxu1 %v2697_v5  ;;  %2350 = vmatpush3.msra.mxu0 %v2779_v8 }
  0x1c   :  { %2339 = vmatpush3.msra.mxu1 %v2779_v8  ;;  %2351 = vmatprep.subr.mxu0 %v2697_v5 }
  0x1d   :  { %2340 = vmatprep.subr.mxu1 %v2697_v5  ;;  %2352 = vmatpush3.msra.mxu0 %v2791_v10 }
  0x1e   :  { %2341 = vmatpush3.msra.mxu1 %v2791_v10  ;;  %2353 = vmatprep.subr.mxu0 %v2697_v5 }
  0x1f   :  { %2342 = vmatprep.subr.mxu1 %v2697_v5  ;;  %2354 = vmatpush3.msra.mxu0 %v2800_v11 }
  0x20   :  { %2343 = vmatpush3.msra.mxu1 %v2800_v11  ;;  %2369 = vmatprep.subr.mxu0 %v2697_v5 }
  0x21   :  { %2358 = vmatprep.subr.mxu1 %v2697_v5  ;;  %2316 = vmatprep.mubr.msk.f32.mxu0 %vm59_vm0, %v45_v51 }
  0x22   :  { %2317 = vmatmul.mubr.msk.f32.gmra.mxu0 %vm59_vm0, %v46_v52 }
  0x23   :  { %2355 = vmatprep.mubr.msk.f32.mxu0 %vm2698_vm1, %v2697_v5 }
  0xd0   :  { %v2827_v12 = vpop.f32.mrf.mxu1 }
  0xd2   :  { %v2829_v13 = vpop.f32.mrf.mxu1 }
  0xd3   :  { %v2315_v14 = vpop.f32.mrf.mxu0 }
  0xd4   :  { %v156_v37 = vadd.f32 %v2315_v14, %v2836_v17 }
  0xd5   :  { %v2831_v15 = vpop.f32.mrf.mxu1  ;;  %v150_v16 = vpop.f32.mrf.mxu0 }
  0xd6   :  { %v151_v19 = vadd.f32 %v2836_v17, %v150_v16 }
  0xd7   :  { %v2838_v18 = vpop.f32.mrf.mxu1 }
  0xd9   :  { %v272_v20 = vpop.f32.mrf.mxu1 }
  0xda   :  { %v276_v21 = vadd.f32 %v272_v20, %v151_v19 }
  0xdb   :  { %v2335_v22 = vpop.f32.mrf.mxu1 }
  0xdc   :  { %2544 = vtanh.f32 %v276_v21  ;;  %v2154_v24 = vmul.f32 -1.442695, %v276_v21 }
  0xde   :  { %2546 = vpow2.f32 %v2154_v24 }
  0xe2   :  { %v2318_v57 = vpop.f32.mrf.mxu0 }
  0xe4   :  { %v160_v58 = vpop.f32.mrf.mxu0 }
  0xe5   :  { %v161_v59 = vadd.f32 %v2836_v17, %v160_v58 }
  0xe9   :  { %v2545_v23 = vpop.eup %2544 }
  0xea   :  { %286 = vrot.lane.b32.xlu0 %v2545_v23, %s2699_s12  ;;  %v166_v23 = vadd.f32 %v2318_v57, %v2836_v17 }
  0xeb   :  { %v2547_v25 = vpop.eup %2546 }
  0xec   :  { %v280_v26 = vadd.f32 1.0, %v2547_v25 }
  0xee   :  { %2548 = vrcp.f32 %v280_v26 }
  0xfb   :  { %v2549_v27 = vpop.eup %2548 }
  0xfc   :  { %v284_v30 = vmul.f32 0.0, %v2549_v27 }
 0x15c   :  { %v287_v28 = vpop.permute.xlu0 %286 }
 0x15d   :  { %v289_v29 = vmul.f32 %v2549_v27, %v287_v28 }
 0x15f   :  { %291 = vrot.lane.b32.xlu0 %v289_v29, %s2700_s2 }
 0x1d1   :  { %v292_v31 = vpop.permute.xlu0 %291 }
 0x1d2   :  { %v294_v32 = vadd.f32 %v292_v31, %v284_v30 }
 0x1d4   :  { %2550 = vtanh.f32 %v294_v32 }
 0x1e1   :  { %v2551_v33 = vpop.eup %2550 }
 0x1e2   :  { %297 = vrot.lane.b32.xlu1 %v2551_v33, %s2699_s12 }
 0x254   :  { %v298_v34 = vpop.permute.xlu1 %297 }
 0x255   :  { %v300_v35 = vmul.f32 %v2549_v27, %v298_v34 }
 0x257   :  { %302 = vrot.lane.b32.xlu1 %v300_v35, %s2700_s2 }
 0x2c9   :  { %v303_v36 = vpop.permute.xlu1 %302 }
 0x2ca   :  { %305 = vst.msk [vmem:[#allocation2] sm:$0xff] %vm202_vm2, %v303_v36  ;;  %2345 = vmatmul.mubr.msk.f32.vlgmr.msra.gmra.mxu1 %vm202_vm2, %v303_v36 }
 0x2cb   :  { %2359 = vmatpush3.msra.mxu1 %v2762_v3  ;;  %2366 = vmatprep.mubr.msk.f32.mxu1 %vm2698_vm1, %v2697_v5 }
 0x2cc   :  { %2360 = vmatprep.subr.mxu1 %v2697_v5 }
 0x2cd   :  { %2361 = vmatpush3.msra.mxu1 %v2779_v8 }
 0x2ce   :  { %2362 = vmatprep.subr.mxu1 %v2697_v5 }
 0x2cf   :  { %2363 = vmatpush3.msra.mxu1 %v2791_v10 }
 0x2d0   :  { %2364 = vmatprep.subr.mxu1 %v2697_v5 }
 0x2d1   :  { %2365 = vmatpush3.msra.mxu1 %v2800_v11 }
 0x2d2   :  { %2380 = vmatprep.subr.mxu1 %v2697_v5 }
 0x38a   :  { %v376_v38 = vpop.f32.mrf.mxu1 }
 0x38b   :  { %v380_v39 = vadd.f32 %v376_v38, %v156_v37 }
 0x38c   :  { %v2346_v40 = vpop.f32.mrf.mxu1 }
 0x38d   :  { %2552 = vtanh.f32 %v380_v39  ;;  %v2156_v42 = vmul.f32 -1.442695, %v380_v39 }
 0x38f   :  { %2554 = vpow2.f32 %v2156_v42 }
 0x39a   :  { %v2553_v41 = vpop.eup %2552 }
 0x39b   :  { %390 = vrot.lane.b32.xlu0 %v2553_v41, %s2699_s12  ;;  %v171_v41 = vadd.f32 %v2836_v17, %v2829_v13 }
 0x39c   :  { %v2555_v43 = vpop.eup %2554 }
 0x39d   :  { %v384_v44 = vadd.f32 1.0, %v2555_v43 }
 0x39f   :  { %2556 = vrcp.f32 %v384_v44 }
 0x3ac   :  { %v2557_v45 = vpop.eup %2556 }
 0x3ad   :  { %v388_v48 = vmul.f32 %v2557_v45, %v294_v32 }
 0x40d   :  { %v391_v46 = vpop.permute.xlu0 %390 }
 0x40e   :  { %v393_v47 = vmul.f32 %v2557_v45, %v391_v46 }
 0x410   :  { %395 = vrot.lane.b32.xlu1 %v393_v47, %s2700_s2 }
 0x482   :  { %v396_v49 = vpop.permute.xlu1 %395 }
 0x483   :  { %v398_v50 = vadd.f32 %v396_v49, %v388_v48 }
 0x485   :  { %2558 = vtanh.f32 %v398_v50 }
 0x492   :  { %v2559_v53 = vpop.eup %2558 }
 0x493   :  { %401 = vrot.lane.b32.xlu0 %v2559_v53, %s2699_s12 }
 0x505   :  { %v402_v54 = vpop.permute.xlu0 %401 }
 0x506   :  { %v404_v55 = vmul.f32 %v2557_v45, %v402_v54 }
 0x508   :  { %406 = vrot.lane.b32.xlu1 %v404_v55, %s2700_s2 }
 0x57a   :  { %v407_v56 = vpop.permute.xlu1 %406 }
 0x57b   :  { %410 = vst.msk [vmem:[#allocation2 + $0x8] sm:$0xff] %vm202_vm2, %v407_v56  ;;  %2356 = vmatmul.mubr.msk.f32.vlgmr.msra.gmra.mxu0 %vm202_vm2, %v407_v56 }
 0x57c   :  { %2370 = vmatpush3.msra.mxu0 %v2762_v3  ;;  %2377 = vmatprep.mubr.msk.f32.mxu0 %vm2698_vm1, %v2697_v5 }
 0x57d   :  { %2371 = vmatprep.subr.mxu0 %v2697_v5 }
 0x57e   :  { %2372 = vmatpush3.msra.mxu0 %v2779_v8 }
 0x57f   :  { %2373 = vmatprep.subr.mxu0 %v2697_v5 }
 0x580   :  { %2374 = vmatpush3.msra.mxu0 %v2791_v10 }
 0x581   :  { %2375 = vmatprep.subr.mxu0 %v2697_v5 }
 0x582   :  { %2376 = vmatpush3.msra.mxu0 %v2800_v11 }
 0x583   :  { %2391 = vmatprep.subr.mxu0 %v2697_v5 }
 0x63b   :  { %v481_v60 = vpop.f32.mrf.mxu0 }
 0x63c   :  { %v485_v61 = vadd.f32 %v481_v60, %v161_v59 }
 0x63d   :  { %v2357_v62 = vpop.f32.mrf.mxu0 }
 0x63e   :  { %2560 = vtanh.f32 %v485_v61  ;;  %v2158_v0 = vmul.f32 -1.442695, %v485_v61 }
 0x640   :  { %2562 = vpow2.f32 %v2158_v0 }
 0x64b   :  { %v2561_v63 = vpop.eup %2560 }
 0x64c   :  { %495 = vrot.lane.b32.xlu0 %v2561_v63, %s2699_s12 }
 0x64d   :  { %v2563_v1 = vpop.eup %2562 }
 0x64e   :  { %v489_v2 = vadd.f32 1.0, %v2563_v1 }
 0x650   :  { %2564 = vrcp.f32 %v489_v2 }
 0x65d   :  { %v2565_v4 = vpop.eup %2564 }
 0x65e   :  { %v493_v9 = vmul.f32 %v2565_v4, %v398_v50 }
 0x6be   :  { %v496_v6 = vpop.permute.xlu0 %495 }
 0x6bf   :  { %v498_v7 = vmul.f32 %v2565_v4, %v496_v6 }
 0x6c1   :  { %500 = vrot.lane.b32.xlu1 %v498_v7, %s2700_s2 }
 0x733   :  { %v501_v14 = vpop.permute.xlu1 %500 }
 0x734   :  { %v503_v16 = vadd.f32 %v501_v14, %v493_v9 }
 0x736   :  { %2566 = vtanh.f32 %v503_v16 }
 0x743   :  { %v2567_v19 = vpop.eup %2566 }
 0x744   :  { %506 = vrot.lane.b32.xlu0 %v2567_v19, %s2699_s12  ;;  %v1041_v19 = vld [vmem:[#allocation2] sm:$0xff] }
 0x7b6   :  { %v507_v20 = vpop.permute.xlu0 %506 }
 0x7b7   :  { %v509_v21 = vmul.f32 %v2565_v4, %v507_v20  ;;  %v1052_v4 = vld [vmem:[%s3186_s4 + $0x18] sm:$0xff]  ;;  %v1050_v20 = vld [vmem:[%s3186_s4 + $0x8] sm:$0xff] }
 0x7b9   :  { %511 = vrot.lane.b32.xlu1 %v509_v21, %s2700_s2  ;;  %v1049_v21 = vld [vmem:[%s3186_s4] sm:$0xff] }
 0x82b   :  { %v512_v22 = vpop.permute.xlu1 %511 }
 0x82c   :  { %515 = vst.msk [vmem:[#allocation2 + $0x10] sm:$0xff] %vm202_vm2, %v512_v22  ;;  %2367 = vmatmul.mubr.msk.f32.vlgmr.msra.gmra.mxu1 %vm202_vm2, %v512_v22  ;;  %v1042_v22 = vld [vmem:[#allocation2 + $0x8] sm:$0xff] }
 0x82d   :  { %2381 = vmatpush3.msra.mxu1 %v2762_v3  ;;  %2388 = vmatprep.mubr.msk.f32.mxu1 %vm2698_vm1, %v2697_v5 }
 0x82e   :  { %2382 = vmatprep.subr.mxu1 %v2697_v5 }
 0x82f   :  { %2383 = vmatpush3.msra.mxu1 %v2779_v8 }
 0x830   :  { %2384 = vmatprep.subr.mxu1 %v2697_v5 }
 0x831   :  { %2385 = vmatpush3.msra.mxu1 %v2791_v10 }
 0x832   :  { %2386 = vmatprep.subr.mxu1 %v2697_v5 }
 0x833   :  { %2387 = vmatpush3.msra.mxu1 %v2800_v11 }
 0x834   :  { %2402 = vmatprep.subr.mxu1 %v2697_v5 }
 0x8ec   :  { %v586_v24 = vpop.f32.mrf.mxu1 }
 0x8ed   :  { %v590_v25 = vadd.f32 %v586_v24, %v166_v23  ;;  %v1043_v23 = vld [vmem:[#allocation2 + $0x10] sm:$0xff] }
 0x8ee   :  { %v2368_v26 = vpop.f32.mrf.mxu1 }
 0x8ef   :  { %2568 = vtanh.f32 %v590_v25  ;;  %v2160_v28 = vmul.f32 -1.442695, %v590_v25 }
 0x8f1   :  { %2570 = vpow2.f32 %v2160_v28 }
 0x8fc   :  { %v2569_v27 = vpop.eup %2568 }
 0x8fd   :  { %600 = vrot.lane.b32.xlu0 %v2569_v27, %s2699_s12  ;;  %v181_v27 = vadd.f32 %v2836_v17, %v2838_v18 }
 0x8fe   :  { %v2571_v29 = vpop.eup %2570 }
 0x8ff   :  { %v594_v30 = vadd.f32 1.0, %v2571_v29 }
 0x901   :  { %2572 = vrcp.f32 %v594_v30 }
 0x90e   :  { %v2573_v31 = vpop.eup %2572 }
 0x90f   :  { %v598_v34 = vmul.f32 %v2573_v31, %v503_v16  ;;  %v1051_v16 = vld [vmem:[%s3186_s4 + $0x10] sm:$0xff] }
 0x96f   :  { %v601_v32 = vpop.permute.xlu0 %600 }
 0x970   :  { %v603_v33 = vmul.f32 %v2573_v31, %v601_v32 }
 0x972   :  { %605 = vrot.lane.b32.xlu1 %v603_v33, %s2700_s2 }
 0x9e4   :  { %v606_v35 = vpop.permute.xlu1 %605 }
 0x9e5   :  { %v608_v36 = vadd.f32 %v606_v35, %v598_v34 }
 0x9e7   :  { %2574 = vtanh.f32 %v608_v36 }
 0x9f4   :  { %v2575_v37 = vpop.eup %2574 }
 0x9f5   :  { %611 = vrot.lane.b32.xlu0 %v2575_v37, %s2699_s12 }
 0xa67   :  { %v612_v38 = vpop.permute.xlu0 %611 }
 0xa68   :  { %v614_v39 = vmul.f32 %v2573_v31, %v612_v38 }
 0xa6a   :  { %616 = vrot.lane.b32.xlu1 %v614_v39, %s2700_s2 }
 0xadc   :  { %v617_v40 = vpop.permute.xlu1 %616 }
 0xadd   :  { %620 = vst.msk [vmem:[#allocation2 + $0x18] sm:$0xff] %vm202_vm2, %v617_v40  ;;  %2378 = vmatmul.mubr.msk.f32.vlgmr.msra.gmra.mxu0 %vm202_vm2, %v617_v40 }
 0xade   :  { %2392 = vmatpush3.msra.mxu0 %v2762_v3  ;;  %2399 = vmatprep.mubr.msk.f32.mxu0 %vm2698_vm1, %v2697_v5 }
 0xadf   :  { %2393 = vmatprep.subr.mxu0 %v2697_v5 }
 0xae0   :  { %2394 = vmatpush3.msra.mxu0 %v2779_v8 }
 0xae1   :  { %2395 = vmatprep.subr.mxu0 %v2697_v5 }
 0xae2   :  { %2396 = vmatpush3.msra.mxu0 %v2791_v10 }
 0xae3   :  { %2397 = vmatprep.subr.mxu0 %v2697_v5 }
 0xae4   :  { %2398 = vmatpush3.msra.mxu0 %v2800_v11  ;;  %v1044_v24 = vld [vmem:[#allocation2 + $0x18] sm:$0xff] }
 0xae5   :  { %2413 = vmatprep.subr.mxu0 %v1052_v4 }
 0xb9d   :  { %v691_v42 = vpop.f32.mrf.mxu0 }
 0xb9e   :  { %v695_v43 = vadd.f32 %v691_v42, %v171_v41  ;;  %v2973_v41 = vld [vmem:[%s3185_s3 + $0x38] sm:$0xff]  ;;  %v2979_v42 = vld [vmem:[%s3185_s3 + $0x30] sm:$0xff] }
 0xb9f   :  { %v2379_v44 = vpop.f32.mrf.mxu0 }
 0xba0   :  { %2576 = vtanh.f32 %v695_v43  ;;  %v2162_v46 = vmul.f32 -1.442695, %v695_v43  ;;  %v2986_v43 = vld [vmem:[%s3185_s3 + $0x28] sm:$0xff]  ;;  %v2993_v44 = vld [vmem:[%s3185_s3 + $0x20] sm:$0xff] }
 0xba2   :  { %2578 = vpow2.f32 %v2162_v46 }
 0xbad   :  { %v2577_v45 = vpop.eup %2576 }
 0xbae   :  { %705 = vrot.lane.b32.xlu0 %v2577_v45, %s2699_s12 }
 0xbaf   :  { %v2579_v47 = vpop.eup %2578 }
 0xbb0   :  { %v699_v48 = vadd.f32 1.0, %v2579_v47 }
 0xbb2   :  { %2580 = vrcp.f32 %v699_v48 }
 0xbbf   :  { %v2581_v49 = vpop.eup %2580 }
 0xbc0   :  { %v703_v52 = vmul.f32 %v2581_v49, %v608_v36 }
 0xc20   :  { %v706_v50 = vpop.permute.xlu0 %705 }
 0xc21   :  { %v708_v51 = vmul.f32 %v2581_v49, %v706_v50 }
 0xc23   :  { %710 = vrot.lane.b32.xlu1 %v708_v51, %s2700_s2 }
 0xc95   :  { %v711_v53 = vpop.permute.xlu1 %710 }
 0xc96   :  { %v713_v13 = vadd.f32 %v711_v53, %v703_v52 }
 0xc98   :  { %2582 = vtanh.f32 %v713_v13 }
 0xca5   :  { %v2583_v54 = vpop.eup %2582 }
 0xca6   :  { %716 = vrot.lane.b32.xlu0 %v2583_v54, %s2699_s12  ;;  %v3030_v54 = vld [vmem:[%s3187_s5] ss:$0 sm:$0xff] }
 0xd18   :  { %v717_v55 = vpop.permute.xlu0 %716 }
 0xd19   :  { %v719_v56 = vmul.f32 %v2581_v49, %v717_v55  ;;  %v186_v49 = vadd.f32 %v2831_v15, %v2836_v17 }
 0xd1b   :  { %721 = vrot.lane.b32.xlu1 %v719_v56, %s2700_s2 }
 0xd8d   :  { %v722_v57 = vpop.permute.xlu1 %721 }
 0xd8e   :  { %725 = vst.msk [vmem:[#allocation2 + $0x20] sm:$0xff] %vm202_vm2, %v722_v57  ;;  %2389 = vmatmul.mubr.msk.f32.vlgmr.msra.gmra.mxu1 %vm202_vm2, %v722_v57 }
 0xd8f   :  { %2403 = vmatpush3.msra.mxu1 %v2762_v3  ;;  %2410 = vmatprep.mubr.msk.f32.mxu1 %vm2698_vm1, %v2697_v5  ;;  %v176_v3 = vadd.f32 %v2827_v12, %v2836_v17 }
 0xd90   :  { %2404 = vmatprep.subr.mxu1 %v2697_v5 }
 0xd91   :  { %2405 = vmatpush3.msra.mxu1 %v2779_v8 }
 0xd92   :  { %2406 = vmatprep.subr.mxu1 %v2697_v5 }
 0xd93   :  { %2407 = vmatpush3.msra.mxu1 %v2791_v10 }
 0xd94   :  { %2408 = vmatprep.subr.mxu1 %v2697_v5 }
 0xd95   :  { %2409 = vmatpush3.msra.mxu1 %v2800_v11  ;;  %v1045_v25 = vld [vmem:[#allocation2 + $0x20] sm:$0xff] }
 0xd96   :  { %2433 = vmatprep.subr.mxu1 %v2697_v5 }
 0xe4e   :  { %v796_v58 = vpop.f32.mrf.mxu1 }
 0xe4f   :  { %v800_v59 = vadd.f32 %v796_v58, %v176_v3 }
 0xe50   :  { %v2390_v60 = vpop.f32.mrf.mxu1 }
 0xe51   :  { %2584 = vtanh.f32 %v800_v59  ;;  %v2164_v8 = vmul.f32 -1.442695, %v800_v59 }
 0xe53   :  { %2586 = vpow2.f32 %v2164_v8 }
 0xe5e   :  { %v2585_v61 = vpop.eup %2584 }
 0xe5f   :  { %810 = vrot.lane.b32.xlu0 %v2585_v61, %s2699_s12 }
 0xe60   :  { %v2587_v62 = vpop.eup %2586 }
 0xe61   :  { %v804_v10 = vadd.f32 1.0, %v2587_v62 }
 0xe63   :  { %2588 = vrcp.f32 %v804_v10 }
 0xe70   :  { %v2589_v63 = vpop.eup %2588 }
 0xe71   :  { %v808_v1 = vmul.f32 %v2589_v63, %v713_v13 }
 0xed1   :  { %v811_v0 = vpop.permute.xlu0 %810 }
 0xed2   :  { %v813_v11 = vmul.f32 %v2589_v63, %v811_v0 }
 0xed4   :  { %815 = vrot.lane.b32.xlu1 %v813_v11, %s2700_s2 }
 0xf46   :  { %v816_v2 = vpop.permute.xlu1 %815 }
 0xf47   :  { %v818_v12 = vadd.f32 %v816_v2, %v808_v1 }
 0xf49   :  { %2590 = vtanh.f32 %v818_v12 }
 0xf56   :  { %v2591_v6 = vpop.eup %2590 }
 0xf57   :  { %821 = vrot.lane.b32.xlu0 %v2591_v6, %s2699_s12 }
 0xfc9   :  { %v822_v7 = vpop.permute.xlu0 %821 }
 0xfca   :  { %v824_v9 = vmul.f32 %v2589_v63, %v822_v7 }
 0xfcc   :  { %826 = vrot.lane.b32.xlu1 %v824_v9, %s2700_s2 }
0x103e   :  { %v827_v14 = vpop.permute.xlu1 %826 }
0x103f   :  { %830 = vst.msk [vmem:[#allocation2 + $0x28] sm:$0xff] %vm202_vm2, %v827_v14  ;;  %2400 = vmatmul.mubr.msk.f32.vlgmr.msra.gmra.mxu0 %vm202_vm2, %v827_v14 }
0x1040   :  { %2414 = vmatpush3.msra.mxu0 %v1052_v4  ;;  %2421 = vmatprep.mubr.msk.f32.mxu0 %vm202_vm2, %v1041_v19 }
0x1041   :  { %2415 = vmatprep.subr.mxu0 %v1051_v16 }
0x1042   :  { %2416 = vmatpush3.msra.mxu0 %v1051_v16 }
0x1043   :  { %2417 = vmatprep.subr.mxu0 %v1050_v20 }
0x1044   :  { %2418 = vmatpush3.msra.mxu0 %v1050_v20 }
0x1045   :  { %2419 = vmatprep.subr.mxu0 %v1049_v21 }
0x1046   :  { %2420 = vmatpush3.msra.mxu0 %v1049_v21  ;;  %v1046_v26 = vld [vmem:[#allocation2 + $0x28] sm:$0xff] }
0x1047   :  { %2422 = vmatmul.mubr.msk.f32.vlgmr.msra.gmra.mxu0 %vm202_vm2, %v1042_v22  ;;  %2455 = vmatprep.subr.mxu0 %v2697_v5 }
0x1048   :  { %2424 = vmatprep.mubr.msk.f32.mxu0 %vm202_vm2, %v1043_v23  ;;  %2456 = vmatpush3.msra.mxu0 %v2973_v41 }
0x1049   :  { %2457 = vmatprep.subr.mxu0 %v2697_v5 }
0x104a   :  { %2458 = vmatpush3.msra.mxu0 %v2979_v42 }
0x104b   :  { %2425 = vmatmul.mubr.msk.f32.gmra.mxu0 %vm202_vm2, %v1044_v24  ;;  %2459 = vmatprep.subr.mxu0 %v2697_v5 }
0x104c   :  { %2427 = vmatprep.mubr.msk.f32.mxu0 %vm202_vm2, %v1045_v25  ;;  %2460 = vmatpush3.msra.mxu0 %v2986_v43 }
0x104d   :  { %2461 = vmatprep.subr.mxu0 %v2697_v5 }
0x104e   :  { %2462 = vmatpush3.msra.mxu0 %v2993_v44 }
0x104f   :  { %2428 = vmatmul.mubr.msk.f32.gmra.mxu0 %vm202_vm2, %v1046_v26  ;;  %2477 = vmatprep.subr.mxu0 %v2697_v5 }
0x10ff   :  { %v901_v28 = vpop.f32.mrf.mxu0 }
0x1100   :  { %v905_v29 = vadd.f32 %v901_v28, %v181_v27 }
0x1101   :  { %v2401_v30 = vpop.f32.mrf.mxu0 }
0x1102   :  { %2592 = vtanh.f32 %v905_v29  ;;  %v2166_v32 = vmul.f32 -1.442695, %v905_v29 }
0x1104   :  { %2594 = vpow2.f32 %v2166_v32 }
0x1107   :  { %v3025_v50 = vpop.f32.mrf.mxu0 }
0x1108   :  { %v1156_v25 = vadd.f32 %v3025_v50, %v3030_v54 }
0x1109   :  { %v1150_v13 = vpop.f32.mrf.mxu0 }
0x110a   :  { %v1151_v55 = vadd.f32 %v3030_v54, %v1150_v13 }
0x110f   :  { %v2593_v31 = vpop.eup %2592 }
0x1110   :  { %915 = vrot.lane.b32.xlu0 %v2593_v31, %s2699_s12 }
0x1111   :  { %v2595_v33 = vpop.eup %2594 }
0x1112   :  { %v909_v34 = vadd.f32 1.0, %v2595_v33 }
0x1114   :  { %2596 = vrcp.f32 %v909_v34 }
0x1121   :  { %v2597_v35 = vpop.eup %2596 }
0x1122   :  { %v913_v38 = vmul.f32 %v2597_v35, %v818_v12 }
0x1182   :  { %v916_v36 = vpop.permute.xlu0 %915 }
0x1183   :  { %v918_v37 = vmul.f32 %v2597_v35, %v916_v36 }
0x1185   :  { %920 = vrot.lane.b32.xlu1 %v918_v37, %s2700_s2 }
0x11f7   :  { %v921_v39 = vpop.permute.xlu1 %920 }
0x11f8   :  { %v2966_v18 = vadd.f32 %v921_v39, %v913_v38 }
0x11fa   :  { %2598 = vtanh.f32 %v2966_v18 }
0x1207   :  { %v2599_v40 = vpop.eup %2598 }
0x1208   :  { %926 = vrot.lane.b32.xlu0 %v2599_v40, %s2699_s12 }
0x127a   :  { %v927_v45 = vpop.permute.xlu0 %926 }
0x127b   :  { %v929_v46 = vmul.f32 %v2597_v35, %v927_v45 }
0x127d   :  { %931 = vrot.lane.b32.xlu1 %v929_v46, %s2700_s2 }
0x12ef   :  { %v932_v47 = vpop.permute.xlu1 %931 }
0x12f0   :  { %935 = vst.msk [vmem:[#allocation2 + $0x30] sm:$0xff] %vm202_vm2, %v932_v47  ;;  %2411 = vmatmul.mubr.msk.f32.vlgmr.msra.gmra.mxu1 %vm202_vm2, %v932_v47 }
0x12f1   :  { %2434 = vmatpush3.msra.mxu1 %v2973_v41  ;;  %2441 = vmatprep.mubr.msk.f32.mxu1 %vm2698_vm1, %v2697_v5 }
0x12f2   :  { %2435 = vmatprep.subr.mxu1 %v2697_v5 }
0x12f3   :  { %2436 = vmatpush3.msra.mxu1 %v2979_v42 }
0x12f4   :  { %2437 = vmatprep.subr.mxu1 %v2697_v5 }
0x12f5   :  { %2438 = vmatpush3.msra.mxu1 %v2986_v43 }
0x12f6   :  { %2439 = vmatprep.subr.mxu1 %v2697_v5 }
0x12f7   :  { %2440 = vmatpush3.msra.mxu1 %v2993_v44  ;;  %v1047_v48 = vld [vmem:[#allocation2 + $0x30] sm:$0xff] }
0x12f8   :  { %2442 = vmatmul.mubr.f32.vlgmr.msra.gmra.mxu1 %v2697_v5  ;;  %2430 = vmatprep.mubr.msk.f32.mxu0 %vm202_vm2, %v1047_v48  ;;  %v2426_v48 = vpop.f32.mrf.mxu0 }
0x12f9   :  { %2444 = vmatprep.subr.mxu1 %v2697_v5  ;;  %2452 = vmatprep.mubr.msk.f32.mxu1 %vm2698_vm1, %v2697_v5 }
0x12fa   :  { %2445 = vmatpush3.msra.mxu1 %v2973_v41 }
0x12fb   :  { %2446 = vmatprep.subr.mxu1 %v2697_v5 }
0x12fc   :  { %2447 = vmatpush3.msra.mxu1 %v2979_v42 }
0x12fd   :  { %2448 = vmatprep.subr.mxu1 %v2697_v5 }
0x12fe   :  { %2449 = vmatpush3.msra.mxu1 %v2986_v43 }
0x12ff   :  { %2450 = vmatprep.subr.mxu1 %v2697_v5 }
0x1300   :  { %2451 = vmatpush3.msra.mxu1 %v2993_v44 }
0x1301   :  { %2466 = vmatprep.subr.mxu1 %v2697_v5 }
0x13b0   :  { %v1006_v51 = vpop.f32.mrf.mxu1 }
0x13b1   :  { %v1010_v52 = vadd.f32 %v1006_v51, %v186_v49  ;;  %v1160_v49 = vpop.f32.mrf.mxu0 }
0x13b2   :  { %v2412_v53 = vpop.f32.mrf.mxu1  ;;  %v1161_v13 = vadd.f32 %v3030_v54, %v1160_v49 }
0x13b3   :  { %v2168_v1 = vmul.f32 -1.442695, %v1010_v52  ;;  %v3076_v50 = vpop.f32.mrf.mxu0 }
0x13b5   :  { %v3078_v51 = vpop.f32.mrf.mxu0 }
0x13b8   :  { %v1269_v56 = vpop.f32.mrf.mxu1 }
0x13b9   :  { %v1273_v57 = vadd.f32 %v1269_v56, %v1151_v55 }
0x13ba   :  { %v2443_v3 = vpop.f32.mrf.mxu1 }
0x13bb   :  { %2600 = vtanh.f32 %v1273_v57  ;;  %v2182_v15 = vmul.f32 -1.442695, %v1273_v57 }
0x13bd   :  { %2602 = vpow2.f32 %v2182_v15 }
0x13c8   :  { %v2601_v58 = vpop.eup %2600 }
0x13c9   :  { %1283 = vrot.lane.b32.xlu0 %v2601_v58, %s2699_s12 }
0x13ca   :  { %v2603_v17 = vpop.eup %2602 }
0x13cb   :  { %v1277_v59 = vadd.f32 1.0, %v2603_v17 }
0x13cd   :  { %2604 = vrcp.f32 %v1277_v59 }
0x13da   :  { %v2605_v60 = vpop.eup %2604 }
0x13db   :  { %v1281_v62 = vmul.f32 0.0, %v2605_v60 }
0x143b   :  { %v1284_v61 = vpop.permute.xlu0 %1283 }
0x143c   :  { %v1286_v8 = vmul.f32 %v2605_v60, %v1284_v61 }
0x143e   :  { %1288 = vrot.lane.b32.xlu1 %v1286_v8, %s2700_s2 }
0x14b0   :  { %v1289_v10 = vpop.permute.xlu1 %1288 }
0x14b1   :  { %v1291_v63 = vadd.f32 %v1289_v10, %v1281_v62 }
0x14b3   :  { %2606 = vtanh.f32 %v1291_v63 }
0x14b4   :  { %2608 = vtanh.f32 %v1010_v52 }
0x14b5   :  { %2610 = vpow2.f32 %v2168_v1 }
0x14c0   :  { %v2607_v0 = vpop.eup %2606 }
0x14c1   :  { %1294 = vrot.lane.b32.xlu0 %v2607_v0, %s2699_s12  ;;  %v2609_v11 = vpop.eup %2608 }
0x14c2   :  { %v2611_v2 = vpop.eup %2610 }
0x14c3   :  { %v1014_v12 = vadd.f32 1.0, %v2611_v2  ;;  %v1166_v2 = vadd.f32 %v2426_v48, %v3030_v54 }
0x14c5   :  { %1020 = vrot.lane.b32.xlu0 %v2609_v11, %s2699_s12  ;;  %2612 = vrcp.f32 %v1014_v12 }
0x14d2   :  { %v2613_v7 = vpop.eup %2612 }
0x14d3   :  { %v1018_v19 = vmul.f32 %v2613_v7, %v2966_v18 }
0x1533   :  { %v1295_v4 = vpop.permute.xlu0 %1294 }
0x1534   :  { %v1297_v6 = vmul.f32 %v2605_v60, %v1295_v4 }
0x1536   :  { %1299 = vrot.lane.b32.xlu1 %v1297_v6, %s2700_s2 }
0x1537   :  { %v1021_v9 = vpop.permute.xlu0 %1020 }
0x1538   :  { %v1023_v14 = vmul.f32 %v2613_v7, %v1021_v9 }
0x153a   :  { %1025 = vrot.lane.b32.xlu0 %v1023_v14, %s2700_s2 }
0x15a8   :  { %v1300_v16 = vpop.permute.xlu1 %1299 }
0x15a9   :  { %1302 = vst.msk [vmem:[#allocation2] sm:$0xff] %vm202_vm2, %v1300_v16  ;;  %2453 = vmatmul.mubr.msk.f32.vlgmr.msra.gmra.mxu1 %vm202_vm2, %v1300_v16 }
0x15aa   :  { %2467 = vmatpush3.msra.mxu1 %v2973_v41  ;;  %2474 = vmatprep.mubr.msk.f32.mxu1 %vm2698_vm1, %v2697_v5 }
0x15ab   :  { %2468 = vmatprep.subr.mxu1 %v2697_v5 }
0x15ac   :  { %v1026_v20 = vpop.permute.xlu0 %1025  ;;  %2469 = vmatpush3.msra.mxu1 %v2979_v42 }
0x15ad   :  { %v1028_v21 = vadd.f32 %v1026_v20, %v1018_v19  ;;  %2470 = vmatprep.subr.mxu1 %v2697_v5 }
0x15ae   :  { %2471 = vmatpush3.msra.mxu1 %v2986_v43 }
0x15af   :  { %2614 = vtanh.f32 %v1028_v21  ;;  %2472 = vmatprep.subr.mxu1 %v2697_v5 }
0x15b0   :  { %2473 = vmatpush3.msra.mxu1 %v2993_v44 }
0x15b1   :  { %2488 = vmatprep.subr.mxu1 %v2697_v5 }
0x15bc   :  { %v2615_v22 = vpop.eup %2614 }
0x15bd   :  { %1031 = vrot.lane.b32.xlu0 %v2615_v22, %s2699_s12 }
0x162f   :  { %v1032_v23 = vpop.permute.xlu0 %1031 }
0x1630   :  { %v1034_v24 = vmul.f32 %v2613_v7, %v1032_v23 }
0x1632   :  { %1036 = vrot.lane.b32.xlu0 %v1034_v24, %s2700_s2 }
0x1669   :  { %v1372_v26 = vpop.f32.mrf.mxu1 }
0x166a   :  { %v1376_v27 = vadd.f32 %v1372_v26, %v1156_v25 }
0x166b   :  { %v2454_v28 = vpop.f32.mrf.mxu1 }
0x166c   :  { %2616 = vtanh.f32 %v1376_v27  ;;  %v2184_v32 = vmul.f32 -1.442695, %v1376_v27 }
0x166e   :  { %2618 = vpow2.f32 %v2184_v32 }
0x1679   :  { %v2617_v29 = vpop.eup %2616 }
0x167a   :  { %1386 = vrot.lane.b32.xlu1 %v2617_v29, %s2699_s12  ;;  %v1171_v29 = vadd.f32 %v3030_v54, %v3078_v51  ;;  %v1176_v51 = vadd.f32 %v3076_v50, %v3030_v54 }
0x167b   :  { %v2619_v33 = vpop.eup %2618 }
0x167c   :  { %v1380_v34 = vadd.f32 1.0, %v2619_v33 }
0x167e   :  { %2620 = vrcp.f32 %v1380_v34 }
0x168b   :  { %v2621_v35 = vpop.eup %2620 }
0x168c   :  { %v1384_v38 = vmul.f32 %v2621_v35, %v1291_v63 }
0x16a4   :  { %v1037_v30 = vpop.permute.xlu0 %1036 }
0x16a5   :  { %1040 = vst.msk [vmem:[#allocation2 + $0x38] sm:$0xff] %vm202_vm2, %v1037_v30 }
0x16ac   :  { %v1048_v31 = vld [vmem:[#allocation2 + $0x38] sm:$0xff] }
0x16ad   :  { %2431 = vmatmul.mubr.msk.f32.gmra.mxu0 %vm202_vm2, %v1048_v31 }
0x16ae   :  { %2463 = vmatprep.mubr.msk.f32.mxu0 %vm2698_vm1, %v2697_v5 }
0x16ec   :  { %v1387_v36 = vpop.permute.xlu1 %1386 }
0x16ed   :  { %v1389_v37 = vmul.f32 %v2621_v35, %v1387_v36 }
0x16ef   :  { %1391 = vrot.lane.b32.xlu1 %v1389_v37, %s2700_s2 }
0x1761   :  { %v1392_v39 = vpop.permute.xlu1 %1391 }
0x1762   :  { %v1394_v18 = vadd.f32 %v1392_v39, %v1384_v38 }
0x1764   :  { %2622 = vtanh.f32 %v1394_v18 }
0x176d   :  { %v3080_v52 = vpop.f32.mrf.mxu0 }
0x176f   :  { %v3082_v53 = vpop.f32.mrf.mxu0 }
0x1771   :  { %v2623_v40 = vpop.eup %2622 }
0x1772   :  { %1397 = vrot.lane.b32.xlu1 %v2623_v40, %s2699_s12 }
0x17e4   :  { %v1398_v45 = vpop.permute.xlu1 %1397 }
0x17e5   :  { %v1400_v46 = vmul.f32 %v2621_v35, %v1398_v45 }
0x17e7   :  { %1402 = vrot.lane.b32.xlu1 %v1400_v46, %s2700_s2 }
0x1859   :  { %v1403_v47 = vpop.permute.xlu1 %1402 }
0x185a   :  { %1405 = vst.msk [vmem:[#allocation2 + $0x8] sm:$0xff] %vm202_vm2, %v1403_v47  ;;  %2464 = vmatmul.mubr.msk.f32.vlgmr.msra.gmra.mxu0 %vm202_vm2, %v1403_v47 }
0x185b   :  { %2478 = vmatpush3.msra.mxu0 %v2973_v41  ;;  %2485 = vmatprep.mubr.msk.f32.mxu0 %vm2698_vm1, %v2697_v5 }
0x185c   :  { %2479 = vmatprep.subr.mxu0 %v2697_v5 }
0x185d   :  { %2480 = vmatpush3.msra.mxu0 %v2979_v42 }
0x185e   :  { %2481 = vmatprep.subr.mxu0 %v2697_v5 }
0x185f   :  { %2482 = vmatpush3.msra.mxu0 %v2986_v43 }
0x1860   :  { %2483 = vmatprep.subr.mxu0 %v2697_v5 }
0x1861   :  { %2484 = vmatpush3.msra.mxu0 %v2993_v44 }
0x1862   :  { %2499 = vmatprep.subr.mxu0 %v2697_v5 }
0x191a   :  { %v1475_v55 = vpop.f32.mrf.mxu0 }
0x191b   :  { %v1479_v56 = vadd.f32 %v1475_v55, %v1161_v13 }
0x191c   :  { %v2465_v57 = vpop.f32.mrf.mxu0 }
0x191d   :  { %2624 = vtanh.f32 %v1479_v56  ;;  %v2186_v58 = vmul.f32 -1.442695, %v1479_v56 }
0x191f   :  { %2626 = vpow2.f32 %v2186_v58 }
0x192a   :  { %v2625_v3 = vpop.eup %2624 }
0x192b   :  { %1489 = vrot.lane.b32.xlu0 %v2625_v3, %s2699_s12 }
0x192c   :  { %v2627_v15 = vpop.eup %2626 }
0x192d   :  { %v1483_v17 = vadd.f32 1.0, %v2627_v15 }
0x192f   :  { %2628 = vrcp.f32 %v1483_v17 }
0x193c   :  { %v2629_v59 = vpop.eup %2628 }
0x193d   :  { %v1487_v8 = vmul.f32 %v2629_v59, %v1394_v18 }
0x199d   :  { %v1490_v60 = vpop.permute.xlu0 %1489 }
0x199e   :  { %v1492_v61 = vmul.f32 %v2629_v59, %v1490_v60 }
0x19a0   :  { %1494 = vrot.lane.b32.xlu1 %v1492_v61, %s2700_s2 }
0x1a12   :  { %v1495_v62 = vpop.permute.xlu1 %1494 }
0x1a13   :  { %v1497_v10 = vadd.f32 %v1495_v62, %v1487_v8  ;;  %v2030_v62 = vld [vmem:[#allocation4 + $0x10] sm:$0xff] }
0x1a15   :  { %2630 = vtanh.f32 %v1497_v10 }
0x1a22   :  { %v2631_v63 = vpop.eup %2630 }
0x1a23   :  { %1500 = vrot.lane.b32.xlu0 %v2631_v63, %s2699_s12  ;;  %v2029_v63 = vld [vmem:[#allocation4 + $0x8] sm:$0xff] }
0x1a95   :  { %v1501_v0 = vpop.permute.xlu0 %1500 }
0x1a96   :  { %v1503_v11 = vmul.f32 %v2629_v59, %v1501_v0  ;;  %v2031_v59 = vld [vmem:[#allocation4 + $0x18] sm:$0xff]  ;;  %v2028_v0 = vld [vmem:[#allocation4] sm:$0xff] }
0x1a98   :  { %1505 = vrot.lane.b32.xlu1 %v1503_v11, %s2700_s2 }
0x1b0a   :  { %v1506_v1 = vpop.permute.xlu1 %1505 }
0x1b0b   :  { %1508 = vst.msk [vmem:[#allocation2 + $0x10] sm:$0xff] %vm202_vm2, %v1506_v1  ;;  %2475 = vmatmul.mubr.msk.f32.vlgmr.msra.gmra.mxu1 %vm202_vm2, %v1506_v1  ;;  %v1181_v1 = vadd.f32 %v3030_v54, %v3082_v53 }
0x1b0c   :  { %2489 = vmatpush3.msra.mxu1 %v2973_v41  ;;  %2496 = vmatprep.mubr.msk.f32.mxu1 %vm2698_vm1, %v2697_v5 }
0x1b0d   :  { %2490 = vmatprep.subr.mxu1 %v2697_v5 }
0x1b0e   :  { %2491 = vmatpush3.msra.mxu1 %v2979_v42 }
0x1b0f   :  { %2492 = vmatprep.subr.mxu1 %v2697_v5 }
0x1b10   :  { %2493 = vmatpush3.msra.mxu1 %v2986_v43 }
0x1b11   :  { %2494 = vmatprep.subr.mxu1 %v2697_v5 }
0x1b12   :  { %2495 = vmatpush3.msra.mxu1 %v2993_v44 }
0x1b13   :  { %2510 = vmatprep.subr.mxu1 %v2697_v5 }
0x1bcb   :  { %v1578_v12 = vpop.f32.mrf.mxu1 }
0x1bcc   :  { %v1582_v4 = vadd.f32 %v1578_v12, %v1166_v2 }
0x1bcd   :  { %v2476_v6 = vpop.f32.mrf.mxu1 }
0x1bce   :  { %2632 = vtanh.f32 %v1582_v4  ;;  %v2188_v9 = vmul.f32 -1.442695, %v1582_v4  ;;  %v3149_v6 = vld [vmem:[%s3189_s7] ss:$0 sm:$0xff] }
0x1bd0   :  { %2634 = vpow2.f32 %v2188_v9 }
0x1bdb   :  { %v2633_v7 = vpop.eup %2632 }
0x1bdc   :  { %1592 = vrot.lane.b32.xlu0 %v2633_v7, %s2699_s12 }
0x1bdd   :  { %v2635_v14 = vpop.eup %2634 }
0x1bde   :  { %v1586_v16 = vadd.f32 1.0, %v2635_v14 }
0x1be0   :  { %2636 = vrcp.f32 %v1586_v16 }
0x1bed   :  { %v2637_v19 = vpop.eup %2636 }
0x1bee   :  { %v1590_v22 = vmul.f32 %v2637_v19, %v1497_v10 }
0x1c4e   :  { %v1593_v20 = vpop.permute.xlu0 %1592 }
0x1c4f   :  { %v1595_v21 = vmul.f32 %v2637_v19, %v1593_v20 }
0x1c51   :  { %1597 = vrot.lane.b32.xlu1 %v1595_v21, %s2700_s2 }
0x1cc3   :  { %v1598_v23 = vpop.permute.xlu1 %1597 }
0x1cc4   :  { %v1600_v24 = vadd.f32 %v1598_v23, %v1590_v22 }
0x1cc6   :  { %2638 = vtanh.f32 %v1600_v24 }
0x1cd3   :  { %v2639_v25 = vpop.eup %2638 }
0x1cd4   :  { %1603 = vrot.lane.b32.xlu0 %v2639_v25, %s2699_s12 }
0x1d46   :  { %v1604_v26 = vpop.permute.xlu0 %1603 }
0x1d47   :  { %v1606_v27 = vmul.f32 %v2637_v19, %v1604_v26 }
0x1d49   :  { %1608 = vrot.lane.b32.xlu1 %v1606_v27, %s2700_s2 }
0x1dbb   :  { %v1609_v28 = vpop.permute.xlu1 %1608 }
0x1dbc   :  { %1611 = vst.msk [vmem:[#allocation2 + $0x18] sm:$0xff] %vm202_vm2, %v1609_v28  ;;  %2486 = vmatmul.mubr.msk.f32.vlgmr.msra.gmra.mxu0 %vm202_vm2, %v1609_v28 }
0x1dbd   :  { %2500 = vmatpush3.msra.mxu0 %v2973_v41  ;;  %2507 = vmatprep.mubr.msk.f32.mxu0 %vm2698_vm1, %v2697_v5 }
0x1dbe   :  { %2501 = vmatprep.subr.mxu0 %v2697_v5 }
0x1dbf   :  { %2502 = vmatpush3.msra.mxu0 %v2979_v42 }
0x1dc0   :  { %2503 = vmatprep.subr.mxu0 %v2697_v5 }
0x1dc1   :  { %2504 = vmatpush3.msra.mxu0 %v2986_v43 }
0x1dc2   :  { %2505 = vmatprep.subr.mxu0 %v2697_v5 }
0x1dc3   :  { %2506 = vmatpush3.msra.mxu0 %v2993_v44 }
0x1dc4   :  { %2521 = vmatprep.subr.mxu0 %v2031_v59 }
0x1e7c   :  { %v1681_v30 = vpop.f32.mrf.mxu0 }
0x1e7d   :  { %v1685_v31 = vadd.f32 %v1681_v30, %v1171_v29 }
0x1e7e   :  { %v2487_v32 = vpop.f32.mrf.mxu0 }
0x1e7f   :  { %2640 = vtanh.f32 %v1685_v31  ;;  %v2190_v34 = vmul.f32 -1.442695, %v1685_v31 }
0x1e81   :  { %2642 = vpow2.f32 %v2190_v34 }
0x1e8c   :  { %v2641_v33 = vpop.eup %2640 }
0x1e8d   :  { %1695 = vrot.lane.b32.xlu0 %v2641_v33, %s2699_s12  ;;  %v1186_v33 = vadd.f32 %v3080_v52, %v3030_v54 }
0x1e8e   :  { %v2643_v35 = vpop.eup %2642 }
0x1e8f   :  { %v1689_v36 = vadd.f32 1.0, %v2643_v35 }
0x1e91   :  { %2644 = vrcp.f32 %v1689_v36 }
0x1e9e   :  { %v2645_v37 = vpop.eup %2644 }
0x1e9f   :  { %v1693_v18 = vmul.f32 %v2645_v37, %v1600_v24 }
0x1eff   :  { %v1696_v38 = vpop.permute.xlu0 %1695 }
0x1f00   :  { %v1698_v39 = vmul.f32 %v2645_v37, %v1696_v38 }
0x1f02   :  { %1700 = vrot.lane.b32.xlu1 %v1698_v39, %s2700_s2 }
0x1f74   :  { %v1701_v40 = vpop.permute.xlu1 %1700 }
0x1f75   :  { %v1703_v45 = vadd.f32 %v1701_v40, %v1693_v18 }
0x1f77   :  { %2646 = vtanh.f32 %v1703_v45 }
0x1f84   :  { %v2647_v46 = vpop.eup %2646 }
0x1f85   :  { %1706 = vrot.lane.b32.xlu0 %v2647_v46, %s2699_s12 }
0x1ff7   :  { %v1707_v47 = vpop.permute.xlu0 %1706 }
0x1ff8   :  { %v1709_v48 = vmul.f32 %v2645_v37, %v1707_v47 }
0x1ffa   :  { %1711 = vrot.lane.b32.xlu1 %v1709_v48, %s2700_s2 }
0x206c   :  { %v1712_v49 = vpop.permute.xlu1 %1711 }
0x206d   :  { %1714 = vst.msk [vmem:[#allocation2 + $0x20] sm:$0xff] %vm202_vm2, %v1712_v49  ;;  %2497 = vmatmul.mubr.msk.f32.vlgmr.msra.gmra.mxu1 %vm202_vm2, %v1712_v49 }
0x206e   :  { %2511 = vmatpush3.msra.mxu1 %v2973_v41  ;;  %2518 = vmatprep.mubr.msk.f32.mxu1 %vm2698_vm1, %v2697_v5 }
0x206f   :  { %2512 = vmatprep.subr.mxu1 %v2697_v5 }
0x2070   :  { %2513 = vmatpush3.msra.mxu1 %v2979_v42 }
0x2071   :  { %2514 = vmatprep.subr.mxu1 %v2697_v5 }
0x2072   :  { %2515 = vmatpush3.msra.mxu1 %v2986_v43 }
0x2073   :  { %2516 = vmatprep.subr.mxu1 %v2697_v5 }
0x2074   :  { %2517 = vmatpush3.msra.mxu1 %v2993_v44  ;;  %v2024_v10 = vld [vmem:[#allocation2 + $0x20] sm:$0xff] }
0x212d   :  { %v1784_v13 = vpop.f32.mrf.mxu1 }
0x212e   :  { %v1788_v41 = vadd.f32 %v1784_v13, %v1176_v51 }
0x212f   :  { %v2498_v55 = vpop.f32.mrf.mxu1 }
0x2130   :  { %2648 = vtanh.f32 %v1788_v41  ;;  %v2192_v57 = vmul.f32 -1.442695, %v1788_v41 }
0x2132   :  { %2650 = vpow2.f32 %v2192_v57 }
0x213d   :  { %v2649_v56 = vpop.eup %2648 }
0x213e   :  { %1798 = vrot.lane.b32.xlu0 %v2649_v56, %s2699_s12 }
0x213f   :  { %v2651_v42 = vpop.eup %2650 }
0x2140   :  { %v1792_v3 = vadd.f32 1.0, %v2651_v42 }
0x2142   :  { %2652 = vrcp.f32 %v1792_v3 }
0x214f   :  { %v2653_v43 = vpop.eup %2652 }
0x2150   :  { %v1796_v44 = vmul.f32 %v2653_v43, %v1703_v45 }
0x21b0   :  { %v1799_v58 = vpop.permute.xlu0 %1798 }
0x21b1   :  { %v1801_v5 = vmul.f32 %v2653_v43, %v1799_v58 }
0x21b3   :  { %1803 = vrot.lane.b32.xlu1 %v1801_v5, %s2700_s2 }
0x2225   :  { %v1804_v15 = vpop.permute.xlu1 %1803 }
0x2226   :  { %v1806_v50 = vadd.f32 %v1804_v15, %v1796_v44 }
0x2228   :  { %2654 = vtanh.f32 %v1806_v50 }
0x2235   :  { %v2655_v17 = vpop.eup %2654 }
0x2236   :  { %1809 = vrot.lane.b32.xlu0 %v2655_v17, %s2699_s12 }
0x22a8   :  { %v1810_v60 = vpop.permute.xlu0 %1809 }
0x22a9   :  { %v1812_v61 = vmul.f32 %v2653_v43, %v1810_v60 }
0x22ab   :  { %1814 = vrot.lane.b32.xlu1 %v1812_v61, %s2700_s2 }
0x231d   :  { %v1815_v8 = vpop.permute.xlu1 %1814 }
0x231e   :  { %1817 = vst.msk [vmem:[#allocation2 + $0x28] sm:$0xff] %vm202_vm2, %v1815_v8  ;;  %2508 = vmatmul.mubr.msk.f32.vlgmr.msra.gmra.mxu0 %vm202_vm2, %v1815_v8 }
0x231f   :  { %2522 = vmatpush3.msra.mxu0 %v2031_v59  ;;  %2529 = vmatprep.mubr.msk.f32.mxu0 %vm202_vm2, %v2024_v10 }
0x2320   :  { %2523 = vmatprep.subr.mxu0 %v2030_v62 }
0x2321   :  { %2524 = vmatpush3.msra.mxu0 %v2030_v62 }
0x2322   :  { %2525 = vmatprep.subr.mxu0 %v2029_v63 }
0x2323   :  { %2526 = vmatpush3.msra.mxu0 %v2029_v63 }
0x2324   :  { %2527 = vmatprep.subr.mxu0 %v2028_v0 }
0x2325   :  { %2528 = vmatpush3.msra.mxu0 %v2028_v0  ;;  %v2025_v11 = vld [vmem:[#allocation2 + $0x28] sm:$0xff] }
0x2326   :  { %2530 = vmatmul.mubr.msk.f32.vlgmr.msra.gmra.mxu0 %vm202_vm2, %v2025_v11 }
0x23de   :  { %v1887_v2 = vpop.f32.mrf.mxu0 }
0x23df   :  { %v1891_v12 = vadd.f32 %v1887_v2, %v1181_v1 }
0x23e0   :  { %v2509_v4 = vpop.f32.mrf.mxu0 }
0x23e1   :  { %2656 = vtanh.f32 %v1891_v12  ;;  %v2194_v19 = vmul.f32 -1.442695, %v1891_v12 }
0x23e3   :  { %2658 = vpow2.f32 %v2194_v19 }
0x23e6   :  { %v2531_v7 = vpop.f32.mrf.mxu0 }
0x23e7   :  { %v2123_v9 = vadd.f32 %v2531_v7, %v3149_v6 }
0x23e8   :  { %v2117_v14 = vpop.f32.mrf.mxu0 }
0x23e9   :  { %2137 = vst [vmem:[%s3190_s8 + $0x8] sm:$0xff] %v2123_v9  ;;  %v2118_v16 = vadd.f32 %v3149_v6, %v2117_v14 }
0x23eb   :  { %2136 = vst [vmem:[%s3190_s8] sm:$0xff] %v2118_v16 }
0x23ee   :  { %v2657_v53 = vpop.eup %2656 }
0x23ef   :  { %1901 = vrot.lane.b32.xlu0 %v2657_v53, %s2699_s12 }
0x23f0   :  { %v2659_v20 = vpop.eup %2658 }
0x23f1   :  { %v1895_v21 = vadd.f32 1.0, %v2659_v20 }
0x23f3   :  { %2660 = vrcp.f32 %v1895_v21 }
0x2400   :  { %v2661_v22 = vpop.eup %2660 }
0x2401   :  { %v1899_v25 = vmul.f32 %v2661_v22, %v1806_v50 }
0x2461   :  { %v1902_v23 = vpop.permute.xlu0 %1901 }
0x2462   :  { %v1904_v24 = vmul.f32 %v2661_v22, %v1902_v23 }
0x2464   :  { %1906 = vrot.lane.b32.xlu1 %v1904_v24, %s2700_s2 }
0x24d6   :  { %v1907_v26 = vpop.permute.xlu1 %1906 }
0x24d7   :  { %v1909_v27 = vadd.f32 %v1907_v26, %v1899_v25 }
0x24d9   :  { %2662 = vtanh.f32 %v1909_v27 }
0x24e6   :  { %v2663_v28 = vpop.eup %2662 }
0x24e7   :  { %1912 = vrot.lane.b32.xlu0 %v2663_v28, %s2699_s12 }
0x2559   :  { %v1913_v29 = vpop.permute.xlu0 %1912 }
0x255a   :  { %v1915_v30 = vmul.f32 %v2661_v22, %v1913_v29 }
0x255c   :  { %1917 = vrot.lane.b32.xlu1 %v1915_v30, %s2700_s2 }
0x25ce   :  { %v1918_v31 = vpop.permute.xlu1 %1917 }
0x25cf   :  { %1920 = vst.msk [vmem:[#allocation2 + $0x30] sm:$0xff] %vm202_vm2, %v1918_v31  ;;  %2519 = vmatmul.mubr.msk.f32.vlgmr.msra.gmra.mxu1 %vm202_vm2, %v1918_v31 }
0x25d6   :  { %v2026_v32 = vld [vmem:[#allocation2 + $0x30] sm:$0xff] }
0x25d7   :  { %2532 = vmatprep.mubr.msk.f32.mxu0 %vm202_vm2, %v2026_v32 }
0x268f   :  { %v1990_v34 = vpop.f32.mrf.mxu1 }
0x2690   :  { %v1994_v35 = vadd.f32 %v1990_v34, %v1186_v33 }
0x2691   :  { %v2520_v36 = vpop.f32.mrf.mxu1 }
0x2692   :  { %2664 = vtanh.f32 %v1994_v35  ;;  %v2196_v38 = vmul.f32 -1.442695, %v1994_v35 }
0x2694   :  { %2666 = vpow2.f32 %v2196_v38 }
0x269f   :  { %v2665_v37 = vpop.eup %2664 }
0x26a0   :  { %2004 = vrot.lane.b32.xlu0 %v2665_v37, %s2699_s12 }
0x26a1   :  { %v2667_v39 = vpop.eup %2666 }
0x26a2   :  { %v1998_v18 = vadd.f32 1.0, %v2667_v39 }
0x26a4   :  { %2668 = vrcp.f32 %v1998_v18 }
0x26b1   :  { %v2669_v40 = vpop.eup %2668 }
0x26b2   :  { %v2002_v47 = vmul.f32 %v2669_v40, %v1909_v27 }
0x2712   :  { %v2005_v45 = vpop.permute.xlu0 %2004 }
0x2713   :  { %v2007_v46 = vmul.f32 %v2669_v40, %v2005_v45 }
0x2715   :  { %2009 = vrot.lane.b32.xlu1 %v2007_v46, %s2700_s2 }
0x2787   :  { %v2010_v48 = vpop.permute.xlu1 %2009 }
0x2788   :  { %v2012_v54 = vadd.f32 %v2010_v48, %v2002_v47 }
0x278a   :  { %2670 = vtanh.f32 %v2012_v54 }
0x2797   :  { %v2671_v52 = vpop.eup %2670 }
0x2798   :  { %2015 = vrot.lane.b32.xlu0 %v2671_v52, %s2699_s12 }
0x280a   :  { %v2016_v49 = vpop.permute.xlu0 %2015 }
0x280b   :  { %v2018_v51 = vmul.f32 %v2669_v40, %v2016_v49 }
0x280d   :  { %2020 = vrot.lane.b32.xlu1 %v2018_v51, %s2700_s2 }
0x287f   :  { %v2021_v13 = vpop.permute.xlu1 %2020 }
0x2880   :  { %2023 = vst.msk [vmem:[#allocation2 + $0x38] sm:$0xff] %vm202_vm2, %v2021_v13 }
0x2887   :  { %v2027_v41 = vld [vmem:[#allocation2 + $0x38] sm:$0xff] }
0x2888   :  { %2533 = vmatmul.mubr.msk.f32.gmra.mxu0 %vm202_vm2, %v2027_v41 }
0x2948   :  { %v2534_v55 = vpop.f32.mrf.mxu0 }
0x2949   :  { %v2133_v56 = vadd.f32 %v2534_v55, %v3149_v6 }
0x294a   :  { %v2127_v57 = vpop.f32.mrf.mxu0 }
0x294b   :  { %2139 = vst [vmem:[%s3190_s8 + $0x18] sm:$0xff] %v2133_v56  ;;  %v2128_v42 = vadd.f32 %v3149_v6, %v2127_v57 }
0x294d   :  { %2138 = vst [vmem:[%s3190_s8 + $0x10] sm:$0xff] %v2128_v42 }
0x294e   :  { %2144 = vsyncpa [#allocation5], 1 }

</bundles_post_ra>
